<compile_context>
chip_gen: v5e
topology: v5e:2x2
jax: 0.10.0
libtpu: 0.0.40
codegen_flags: <defaults>
</compile_context>

<pallas_src>
import jax
import jax.numpy as jnp
from jax.experimental import pallas as pl
from jax.experimental.pallas import tpu as pltpu


# ---------------------------------------------------------------------------
# VMEM sizing helpers (generation aware, double-buffering aware)
# ---------------------------------------------------------------------------
def _cdiv(a, b):
    return -(-a // b)


def _vreg_padded_bytes(shape, itemsize):
    """Approx VMEM footprint of a buffer after native (sublane, lane) tile padding."""
    shape = tuple(int(d) for d in shape)
    if len(shape) < 2:
        shape = (1,) * (2 - len(shape)) + shape
    lane = 128 * _cdiv(shape[-1], 128)
    sub_tile = 8 * max(1, 4 // itemsize)          # 8 rows for f32, 16 for bf16
    sub = sub_tile * _cdiv(shape[-2], sub_tile)
    outer = 1
    for d in shape[:-2]:
        outer *= d
    return outer * sub * lane * itemsize


def _pick_tile(total_rows, bytes_fn, budget_bytes):
    """Largest divisor of total_rows (preferring multiples of 8) whose VMEM estimate fits."""
    divs = sorted((d for d in range(1, total_rows + 1) if total_rows % d == 0), reverse=True)
    for d in [d for d in divs if d % 8 == 0] + [d for d in divs if d % 8 != 0]:
        if bytes_fn(d) <= budget_bytes:
            return d
    return 1


def _vmem_limit_bytes():
    """Scoped-VMEM limit: physical capacity minus headroom for compiler scratch/spills."""
    try:
        cap = int(pltpu.get_tpu_info().vmem_capacity_bytes)
    except Exception:
        cap = 64 * 1024 * 1024                    # conservative (v7x per-TC) fallback
    return max(32 * 1024 * 1024, cap - 24 * 1024 * 1024)


# ---------------------------------------------------------------------------
# Pallas kernels
# ---------------------------------------------------------------------------
def _conv_phase_kernel(x_ref, w_ref, o_ref, st_ref):
    """Polyphase ConvTranspose2d(k=4, s=2, p=1) row tile + fused BN partial statistics.

    x_ref : (1, H+2, W+2, Cin)   zero-padded input (bf16), resident across row tiles
    w_ref : (4, 4, Cin, Cout)    [phase=py*2+px, tap=dy*2+dx] 1x1 matmul weights (bf16)
    o_ref : (1, TQ, 4, W, Cout)  conv output row tile, phase-form (bf16)
    st_ref: (1, 1, 2, Cout)      row 0 = sum, row 1 = sum-of-squares of this tile (f32)
    """
    TQ = o_ref.shape[1]
    W = o_ref.shape[3]
    Cin = x_ref.shape[3]
    Cout = o_ref.shape[4]

    t = pl.program_id(1)
    row0 = pl.multiple_of(t * TQ, TQ)
    xt = x_ref[0, pl.ds(row0, TQ + 2), :, :]                  # (TQ+2, W+2, Cin) bf16

    s = jnp.zeros((1, Cout), jnp.float32)
    ss = jnp.zeros((1, Cout), jnp.float32)
    # Four output phases (oy%2, ox%2); each phase is a 2x2 conv = 4 accumulating matmuls
    # (no im2col lane-concat temp).
    for p_idx, (py, px) in enumerate(((0, 0), (0, 1), (1, 0), (1, 1))):
        acc = jnp.zeros((TQ * W, Cout), jnp.float32)
        for dy in range(2):
            for dx in range(2):
                tap = xt[py + dy:py + dy + TQ,
                         px + dx:px + dx + W, :].reshape(TQ * W, Cin)
                acc = acc + jnp.dot(tap, w_ref[p_idx, dy * 2 + dx, :, :],
                                    preferred_element_type=jnp.float32)
        s = s + jnp.sum(acc, axis=0, keepdims=True)
        ss = ss + jnp.sum(acc * acc, axis=0, keepdims=True)
        o_ref[0, :, p_idx, :, :] = acc.reshape(TQ, W, Cout).astype(o_ref.dtype)

    st_ref[0, 0, 0:1, :] = s
    st_ref[0, 0, 1:2, :] = ss


def _fuse_kernel(fc_ref, cv_ref, mfc_ref, mcv_ref, sc_ref, sh_ref, ofc_ref, ocv_ref):
    """BN affine (conv channels) + mask multiply + LeakyReLU(0.2), fully lane-dense.

    fc_ref : (1, TH, 4*W*C1)    skip features (f32, phase-flat)
    cv_ref : (1, TH, 4*W*Cout)  conv output (bf16, phase-flat)
    mfc_ref: (1, TH, 4*W*C1)    mask, skip-channel range (f32)
    mcv_ref: (1, TH, 4*W*Cout)  mask, conv-channel range (f32)
    sc_ref / sh_ref: (1, 4*W*Cout)  BN scale / shift pre-tiled along the flat axis
    ofc_ref / ocv_ref: the two output channel ranges (f32) -- no in-kernel concat.
    """
    a = fc_ref[0] * mfc_ref[0]
    ofc_ref[0] = jnp.where(a >= 0, a, 0.2 * a)
    b = (cv_ref[0].astype(jnp.float32) * sc_ref[...] + sh_ref[...]) * mcv_ref[0]
    ocv_ref[0] = jnp.where(b >= 0, b, 0.2 * b)


# ---------------------------------------------------------------------------
# Layout helpers (pure XLA glue; one transpose per tensor == the NCHW boundary cost.
# The trailing flatten/unflatten reshapes are row-major bitcasts, i.e. free.)
# ---------------------------------------------------------------------------
def _phase_split_flat(t_nchw):
    """(N, C, 2H, 2W) NCHW -> (N, H, 4*W*C) phase-flat; flat idx = (p*W + w)*C + c,
    phase p = (oy%2)*2 + (ox%2)."""
    N, C, OH, OW = t_nchw.shape
    H, W = OH // 2, OW // 2
    t6 = t_nchw.reshape(N, C, H, 2, W, 2)
    return t6.transpose(0, 2, 3, 5, 4, 1).reshape(N, H, 4 * W * C)


def _phase_merge_flat(t_flat, C):
    """(N, H, 4*W*C) phase-flat -> (N, C, 2H, 2W) NCHW."""
    N, H, L = t_flat.shape
    W = L // (4 * C)
    t6 = t_flat.reshape(N, H, 2, 2, W, C)
    return t6.transpose(0, 5, 1, 2, 4, 3).reshape(N, C, 2 * H, 2 * W)


# ---------------------------------------------------------------------------
# Forward pass
# ---------------------------------------------------------------------------
def up_adaptive_conv(forConcat, inputFeatures, maskFeatures, weight,
                     kernel_size=4, stride=2, padding=1, eps=1e-5):
    """forConcat:(N,C1,OH,OW)  inputFeatures:(N,Cin,H,W)  maskFeatures:(N,C1+Cout,OH,OW)
    weight:(Cin,Cout,K,K) (PyTorch ConvTranspose2d layout). Returns NCHW (N,C1+Cout,OH,OW)."""
    assert kernel_size == 4 and stride == 2 and padding == 1, \
        "polyphase path is specialized to ConvTranspose2d(kernel=4, stride=2, padding=1)"
    N, Cin, H, W = inputFeatures.shape
    Cout = weight.shape[1]
    C1 = forConcat.shape[1]
    OH, OW = 2 * H, 2 * W
    Lcv = 4 * W * Cout
    Lfc = 4 * W * C1

    vmem_limit = _vmem_limit_bytes()
    budget = int(0.7 * vmem_limit)            # tile-picker budget (leaves pipeline headroom)

    # --- boundary layout changes forced by the NCHW interface -----------------------------
    x = jnp.transpose(inputFeatures, (0, 2, 3, 1)).astype(jnp.bfloat16)      # N,H,W,Cin
    x_pad = jnp.pad(x, ((0, 0), (1, 1), (1, 1), (0, 0)))                     # N,H+2,W+2,Cin

    # per-phase / per-tap 1x1 matmul weights:
    #   wmat[p=py*2+px, k=dy*2+dx, ci, co] = weight[ci, co, 3-py-2*dy, 3-px-2*dx]
    W_t = jnp.transpose(weight, (2, 3, 0, 1))                                # (K,K,Cin,Cout)
    wmat = jnp.stack(
        [jnp.stack([W_t[3 - py - 2 * dy, 3 - px - 2 * dx]
                    for dy in range(2) for dx in range(2)], axis=0)
         for py in range(2) for px in range(2)],
        axis=0).astype(jnp.bfloat16)                                         # (4,4,Cin,Cout)

    # phase-flat skip / mask tensors; mask channel ranges pre-split so the fuse kernel never
    # concatenates along the lane axis.
    fc_flat = _phase_split_flat(forConcat.astype(jnp.float32))               # (N,H,Lfc)
    mk_fc = _phase_split_flat(maskFeatures[:, :C1].astype(jnp.float32))      # (N,H,Lfc)
    mk_cv = _phase_split_flat(maskFeatures[:, C1:].astype(jnp.float32))      # (N,H,Lcv)

    # --- kernel 1: polyphase transposed conv (bf16 MXU, f32 accum) + fused BN partials ----
    def conv_vmem(tq):
        dbl = 2                                               # double-buffered pipeline blocks
        b = dbl * _vreg_padded_bytes((H + 2, W + 2, Cin), 2)  # resident padded input
        b += dbl * _vreg_padded_bytes((16, Cin, Cout), 2)     # weights
        b += dbl * _vreg_padded_bytes((tq * 4, W, Cout), 2)   # bf16 conv out block
        b += dbl * _vreg_padded_bytes((2, Cout), 4)           # stats block
        b += _vreg_padded_bytes((tq + 2, W + 2, Cin), 2)      # xt slice temp
        b += 2 * _vreg_padded_bytes((tq * W, Cout), 4)        # f32 accumulator temps
        b += 2 * _vreg_padded_bytes((tq * W, Cin), 2)         # tap temps
        return b

    TQ = _pick_tile(H, conv_vmem, budget)
    n_qt = H // TQ
    conv_pf, stats = pl.pallas_call(
        _conv_phase_kernel,
        out_shape=(jax.ShapeDtypeStruct((N, H, 4, W, Cout), jnp.bfloat16),
                   jax.ShapeDtypeStruct((N, n_qt, 2, Cout), jnp.float32)),
        grid=(N, n_qt),
        in_specs=[
            # TODO(synk): for very large images switch to a halo'd row tile (pl.Element on the
            # row axis) so the padded input need not stay VMEM-resident on v7x's 64 MiB/TC.
            pl.BlockSpec((1, H + 2, W + 2, Cin), lambda n, t: (n, 0, 0, 0)),
            pl.BlockSpec((4, 4, Cin, Cout), lambda n, t: (0, 0, 0, 0))],
        out_specs=(pl.BlockSpec((1, TQ, 4, W, Cout), lambda n, t: (n, t, 0, 0, 0)),
                   pl.BlockSpec((1, 1, 2, Cout), lambda n, t: (n, t, 0, 0))),
        compiler_params=pltpu.CompilerParams(
            dimension_semantics=("parallel", "parallel"),
            vmem_limit_bytes=int(vmem_limit)),
    )(x_pad, wmat)

    # Lane-dense flat view for the fuse pass; row-major (N,H,4,W,Cout)->(N,H,4*W*Cout) is a
    # free bitcast reshape (no extra HBM pass).
    cv_flat = conv_pf.reshape(N, H, Lcv)

    # --- BatchNorm2d batch statistics from fused partials (gamma=1, beta=0) ---------------
    # NOTE: single-pass E[x^2]-E[x]^2 (fine here; use centered per-tile sums if this ever
    # feeds training with large conv means).
    # TODO(synk): running_mean/running_var momentum updates are not emitted.
    count = jnp.float32(N * OH * OW)
    csum = jnp.sum(stats[:, :, 0, :], axis=(0, 1))
    csqs = jnp.sum(stats[:, :, 1, :], axis=(0, 1))
    mean = csum / count
    var = jnp.maximum(csqs / count - mean * mean, 0.0)        # biased variance (PyTorch BN)
    invstd = jax.lax.rsqrt(var + eps)
    scale_t = jnp.tile(invstd, 4 * W).reshape(1, Lcv)         # pre-tiled along the flat axis
    shift_t = jnp.tile(-mean * invstd, 4 * W).reshape(1, Lcv)

    # --- kernel 2: BN affine + mask multiply + LeakyReLU(0.2), all operands lane-dense ----
    def fuse_vmem(th):
        dbl = 2
        b = dbl * (2 * _vreg_padded_bytes((th, Lfc), 4)       # fc in + fc out
                   + _vreg_padded_bytes((th, Lcv), 2)         # conv in (bf16)
                   + _vreg_padded_bytes((th, Lfc), 4)         # mask (skip range)
                   + 2 * _vreg_padded_bytes((th, Lcv), 4)     # mask (conv range) + conv out
                   + 2 * _vreg_padded_bytes((1, Lcv), 4))     # scale / shift
        b += 2 * _vreg_padded_bytes((th, Lcv), 4)             # in-kernel f32 temps
        b += 2 * _vreg_padded_bytes((th, Lfc), 4)
        return b

    TH = _pick_tile(H, fuse_vmem, budget)
    n_ht = H // TH
    out_fc, out_cv = pl.pallas_call(
        _fuse_kernel,
        out_shape=(jax.ShapeDtypeStruct((N, H, Lfc), jnp.float32),
                   jax.ShapeDtypeStruct((N, H, Lcv), jnp.float32)),
        grid=(N, n_ht),
        in_specs=[pl.BlockSpec((1, TH, Lfc), lambda n, t: (n, t, 0)),
                  pl.BlockSpec((1, TH, Lcv), lambda n, t: (n, t, 0)),
                  pl.BlockSpec((1, TH, Lfc), lambda n, t: (n, t, 0)),
                  pl.BlockSpec((1, TH, Lcv), lambda n, t: (n, t, 0)),
                  pl.BlockSpec((1, Lcv), lambda n, t: (0, 0)),
                  pl.BlockSpec((1, Lcv), lambda n, t: (0, 0))],
        out_specs=(pl.BlockSpec((1, TH, Lfc), lambda n, t: (n, t, 0)),
                   pl.BlockSpec((1, TH, Lcv), lambda n, t: (n, t, 0))),
        compiler_params=pltpu.CompilerParams(
            dimension_semantics=("parallel", "parallel"),
            vmem_limit_bytes=int(vmem_limit)),
    )(fc_flat, cv_flat, mk_fc, mk_cv, scale_t, shift_t)

    # TODO(synk): if the surrounding model can consume phase-form / NHWC directly, the two
    # _phase_split calls above and this merge (the remaining full-tensor HBM passes) go away.
    return jnp.concatenate([_phase_merge_flat(out_fc, C1),
                            _phase_merge_flat(out_cv, Cout)], axis=1)


# ---------------------------------------------------------------------------
# Pure-JAX reference (transposed conv via dilated conv) for a numerical sanity check
# ---------------------------------------------------------------------------
def _reference(forConcat, inputFeatures, maskFeatures, weight, eps=1e-5):
    w_flip = jnp.flip(weight, axis=(2, 3)).transpose(1, 0, 2, 3)   # (Cout, Cin, K, K)
    conv = jax.lax.conv_general_dilated(
        inputFeatures.astype(jnp.bfloat16), w_flip.astype(jnp.bfloat16),
        window_strides=(1, 1), padding=((2, 2), (2, 2)),
        lhs_dilation=(2, 2), rhs_dilation=(1, 1),
        dimension_numbers=("NCHW", "OIHW", "NCHW"),
        preferred_element_type=jnp.float32)
    mean = jnp.mean(conv, axis=(0, 2, 3), keepdims=True)
    var = jnp.mean((conv - mean) ** 2, axis=(0, 2, 3), keepdims=True)
    bn = (conv - mean) / jnp.sqrt(var + eps)
    cat = jnp.concatenate([forConcat.astype(jnp.float32), bn], axis=1)
    y = cat * maskFeatures.astype(jnp.float32)
    return jnp.where(y >= 0, y, 0.2 * y)


if __name__ == "__main__":
    key = jax.random.PRNGKey(0)
    k_w, k_fc, k_in, k_mk = jax.random.split(key, 4)

    N, Cin, Cout, H, W, K = 2, 4, 4, 8, 8, 4
    OH, OW = 2 * H, 2 * W
    C1 = Cout                 # skip-connection channels
    Ctot = C1 + Cout

    # ConvTranspose2d weight, init N(0, 0.02) per weights_init('gaussian'); bias=False.
    weight = 0.02 * jax.random.normal(k_w, (Cin, Cout, K, K), jnp.float32)
    forConcat = jax.random.normal(k_fc, (N, C1, OH, OW), jnp.float32)
    inputFeatures = jax.random.normal(k_in, (N, Cin, H, W), jnp.float32)
    maskFeatures = jax.random.uniform(k_mk, (N, Ctot, OH, OW), jnp.float32)

    out = jax.jit(up_adaptive_conv)(forConcat, inputFeatures, maskFeatures, weight)
    jax.block_until_ready(out)
    assert out.shape == (N, Ctot, OH, OW)

    ref = _reference(forConcat, inputFeatures, maskFeatures, weight)
    err = float(jnp.max(jnp.abs(out - ref)))
    # Tolerance covers the bf16-stored conv intermediate: after BN normalization its rounding
    # error is ~z * 2^-8 (z = standardized conv value), i.e. ~1.5e-2 worst case at |z|~3.5.
    assert err < 3e-2, f"max abs error vs reference: {err}"
    print("KERNEL_OK")
</pallas_src>

<mosaic_0001>
module attributes {stable_mosaic.version = 11 : i64} {
  func.func @_conv_phase_kernel(%arg0: i32, %arg1: i32, %arg2: memref<1x10x10x4xbf16, #tpu.memory_space<vmem>>, %arg3: memref<4x4x4x4xbf16, #tpu.memory_space<vmem>>, %arg4: memref<1x8x4x8x4xbf16, #tpu.memory_space<vmem>>, %arg5: memref<1x1x2x4xf32, #tpu.memory_space<vmem>>) attributes {dimension_semantics = [#tpu.dimension_semantics<parallel>, #tpu.dimension_semantics<parallel>], iteration_bounds = array<i64: 2, 1>, scalar_prefetch = 0 : i64, scratch_operands = 0 : i64, tpu.core_type = #tpu.core_type<tc>, window_params = [{transform_indices = @transform_0, window_bounds = array<i64: 1, 10, 10, 4>}, {pipeline_mode = #tpu.pipeline_mode<synchronous>, transform_indices = @transform_1, window_bounds = array<i64: 4, 4, 4, 4>}, {transform_indices = @transform_2, window_bounds = array<i64: 1, 8, 4, 8, 4>}, {transform_indices = @transform_3, window_bounds = array<i64: 1, 1, 2, 4>}]} {
    %c8_i32 = arith.constant 8 : i32
    %0 = arith.muli %arg1, %c8_i32 : i32
    %1 = tpu.assume_multiple %0, 8 : i32
    %c0 = arith.constant 0 : index
    %2 = arith.index_cast %1 : i32 to index
    %c0_0 = arith.constant 0 : index
    %c0_1 = arith.constant 0 : index
    %3 = vector.load %arg2[%c0, %2, %c0_0, %c0_1] : memref<1x10x10x4xbf16, #tpu.memory_space<vmem>>, vector<1x10x10x4xbf16>
    %4 = vector.shape_cast %3 : vector<1x10x10x4xbf16> to vector<10x10x4xbf16>
    %cst = arith.constant 0.000000e+00 : f32
    %5 = vector.broadcast %cst : f32 to vector<1x4xf32>
    %cst_2 = arith.constant 0.000000e+00 : f32
    %6 = vector.broadcast %cst_2 : f32 to vector<1x4xf32>
    %cst_3 = arith.constant 0.000000e+00 : f32
    %7 = vector.broadcast %cst_3 : f32 to vector<64x4xf32>
    %8 = vector.extract_strided_slice %4 {offsets = [0, 0, 0], sizes = [8, 8, 4], strides = [1, 1, 1]} : vector<10x10x4xbf16> to vector<8x8x4xbf16>
    %9 = vector.shape_cast %8 : vector<8x8x4xbf16> to vector<64x4xbf16>
    %c0_4 = arith.constant 0 : index
    %c0_5 = arith.constant 0 : index
    %c0_6 = arith.constant 0 : index
    %c0_7 = arith.constant 0 : index
    %10 = vector.load %arg3[%c0_4, %c0_5, %c0_6, %c0_7] : memref<4x4x4x4xbf16, #tpu.memory_space<vmem>>, vector<1x1x4x4xbf16>
    %11 = vector.shape_cast %10 : vector<1x1x4x4xbf16> to vector<4x4xbf16>
    %cst_8 = arith.constant dense<0.000000e+00> : vector<64x4xf32>
    %12 = tpu.matmul %9, %11, %cst_8 {dimension_numbers = #tpu.dot_dimension_numbers<[1], [0], [0], [1], [0, 0, 1, 1], [], []>} : vector<64x4xbf16>, vector<4x4xbf16>, vector<64x4xf32> -> vector<64x4xf32>
    %13 = arith.addf %7, %12 : vector<64x4xf32>
    %14 = vector.extract_strided_slice %4 {offsets = [0, 1, 0], sizes = [8, 8, 4], strides = [1, 1, 1]} : vector<10x10x4xbf16> to vector<8x8x4xbf16>
    %15 = vector.shape_cast %14 : vector<8x8x4xbf16> to vector<64x4xbf16>
    %c0_9 = arith.constant 0 : index
    %c1 = arith.constant 1 : index
    %c0_10 = arith.constant 0 : index
    %c0_11 = arith.constant 0 : index
    %16 = vector.load %arg3[%c0_9, %c1, %c0_10, %c0_11] : memref<4x4x4x4xbf16, #tpu.memory_space<vmem>>, vector<1x1x4x4xbf16>
    %17 = vector.shape_cast %16 : vector<1x1x4x4xbf16> to vector<4x4xbf16>
    %cst_12 = arith.constant dense<0.000000e+00> : vector<64x4xf32>
    %18 = tpu.matmul %15, %17, %cst_12 {dimension_numbers = #tpu.dot_dimension_numbers<[1], [0], [0], [1], [0, 0, 1, 1], [], []>} : vector<64x4xbf16>, vector<4x4xbf16>, vector<64x4xf32> -> vector<64x4xf32>
    %19 = arith.addf %13, %18 : vector<64x4xf32>
    %20 = vector.extract_strided_slice %4 {offsets = [1, 0, 0], sizes = [8, 8, 4], strides = [1, 1, 1]} : vector<10x10x4xbf16> to vector<8x8x4xbf16>
    %21 = vector.shape_cast %20 : vector<8x8x4xbf16> to vector<64x4xbf16>
    %c0_13 = arith.constant 0 : index
    %c2 = arith.constant 2 : index
    %c0_14 = arith.constant 0 : index
    %c0_15 = arith.constant 0 : index
    %22 = vector.load %arg3[%c0_13, %c2, %c0_14, %c0_15] : memref<4x4x4x4xbf16, #tpu.memory_space<vmem>>, vector<1x1x4x4xbf16>
    %23 = vector.shape_cast %22 : vector<1x1x4x4xbf16> to vector<4x4xbf16>
    %cst_16 = arith.constant dense<0.000000e+00> : vector<64x4xf32>
    %24 = tpu.matmul %21, %23, %cst_16 {dimension_numbers = #tpu.dot_dimension_numbers<[1], [0], [0], [1], [0, 0, 1, 1], [], []>} : vector<64x4xbf16>, vector<4x4xbf16>, vector<64x4xf32> -> vector<64x4xf32>
    %25 = arith.addf %19, %24 : vector<64x4xf32>
    %26 = vector.extract_strided_slice %4 {offsets = [1, 1, 0], sizes = [8, 8, 4], strides = [1, 1, 1]} : vector<10x10x4xbf16> to vector<8x8x4xbf16>
    %27 = vector.shape_cast %26 : vector<8x8x4xbf16> to vector<64x4xbf16>
    %c0_17 = arith.constant 0 : index
    %c3 = arith.constant 3 : index
    %c0_18 = arith.constant 0 : index
    %c0_19 = arith.constant 0 : index
    %28 = vector.load %arg3[%c0_17, %c3, %c0_18, %c0_19] : memref<4x4x4x4xbf16, #tpu.memory_space<vmem>>, vector<1x1x4x4xbf16>
    %29 = vector.shape_cast %28 : vector<1x1x4x4xbf16> to vector<4x4xbf16>
    %cst_20 = arith.constant dense<0.000000e+00> : vector<64x4xf32>
    %30 = tpu.matmul %27, %29, %cst_20 {dimension_numbers = #tpu.dot_dimension_numbers<[1], [0], [0], [1], [0, 0, 1, 1], [], []>} : vector<64x4xbf16>, vector<4x4xbf16>, vector<64x4xf32> -> vector<64x4xf32>
    %31 = arith.addf %25, %30 : vector<64x4xf32>
    %cst_21 = arith.constant dense<0.000000e+00> : vector<4xf32>
    %32 = vector.multi_reduction <add>, %31, %cst_21 [0] : vector<64x4xf32> to vector<4xf32>
    %33 = vector.shape_cast %32 : vector<4xf32> to vector<1x4xf32>
    %34 = arith.addf %5, %33 : vector<1x4xf32>
    %35 = arith.mulf %31, %31 : vector<64x4xf32>
    %cst_22 = arith.constant dense<0.000000e+00> : vector<4xf32>
    %36 = vector.multi_reduction <add>, %35, %cst_22 [0] : vector<64x4xf32> to vector<4xf32>
    %37 = vector.shape_cast %36 : vector<4xf32> to vector<1x4xf32>
    %38 = arith.addf %6, %37 : vector<1x4xf32>
    %39 = vector.shape_cast %31 : vector<64x4xf32> to vector<8x8x4xf32>
    %40 = arith.truncf %39 : vector<8x8x4xf32> to vector<8x8x4xbf16>
    %c0_23 = arith.constant 0 : index
    %c0_24 = arith.constant 0 : index
    %c0_25 = arith.constant 0 : index
    %c0_26 = arith.constant 0 : index
    %c0_27 = arith.constant 0 : index
    %41 = vector.load %arg4[%c0_23, %c0_24, %c0_25, %c0_26, %c0_27] : memref<1x8x4x8x4xbf16, #tpu.memory_space<vmem>>, vector<1x8x1x8x4xbf16>
    %42 = vector.shape_cast %41 : vector<1x8x1x8x4xbf16> to vector<8x8x4xbf16>
    %43 = vector.shape_cast %40 : vector<8x8x4xbf16> to vector<1x8x1x8x4xbf16>
    tpu.vector_store %arg4[%c0_23, %c0_24, %c0_25, %c0_26, %c0_27], %43 {strides = array<i32>} : memref<1x8x4x8x4xbf16, #tpu.memory_space<vmem>>, vector<1x8x1x8x4xbf16>,
    %cst_28 = arith.constant 0.000000e+00 : f32
    %44 = vector.broadcast %cst_28 : f32 to vector<64x4xf32>
    %45 = vector.extract_strided_slice %4 {offsets = [0, 1, 0], sizes = [8, 8, 4], strides = [1, 1, 1]} : vector<10x10x4xbf16> to vector<8x8x4xbf16>
    %46 = vector.shape_cast %45 : vector<8x8x4xbf16> to vector<64x4xbf16>
    %c1_29 = arith.constant 1 : index
    %c0_30 = arith.constant 0 : index
    %c0_31 = arith.constant 0 : index
    %c0_32 = arith.constant 0 : index
    %47 = vector.load %arg3[%c1_29, %c0_30, %c0_31, %c0_32] : memref<4x4x4x4xbf16, #tpu.memory_space<vmem>>, vector<1x1x4x4xbf16>
    %48 = vector.shape_cast %47 : vector<1x1x4x4xbf16> to vector<4x4xbf16>
    %cst_33 = arith.constant dense<0.000000e+00> : vector<64x4xf32>
    %49 = tpu.matmul %46, %48, %cst_33 {dimension_numbers = #tpu.dot_dimension_numbers<[1], [0], [0], [1], [0, 0, 1, 1], [], []>} : vector<64x4xbf16>, vector<4x4xbf16>, vector<64x4xf32> -> vector<64x4xf32>
    %50 = arith.addf %44, %49 : vector<64x4xf32>
    %51 = vector.extract_strided_slice %4 {offsets = [0, 2, 0], sizes = [8, 8, 4], strides = [1, 1, 1]} : vector<10x10x4xbf16> to vector<8x8x4xbf16>
    %52 = vector.shape_cast %51 : vector<8x8x4xbf16> to vector<64x4xbf16>
    %c1_34 = arith.constant 1 : index
    %c1_35 = arith.constant 1 : index
    %c0_36 = arith.constant 0 : index
    %c0_37 = arith.constant 0 : index
    %53 = vector.load %arg3[%c1_34, %c1_35, %c0_36, %c0_37] : memref<4x4x4x4xbf16, #tpu.memory_space<vmem>>, vector<1x1x4x4xbf16>
    %54 = vector.shape_cast %53 : vector<1x1x4x4xbf16> to vector<4x4xbf16>
    %cst_38 = arith.constant dense<0.000000e+00> : vector<64x4xf32>
    %55 = tpu.matmul %52, %54, %cst_38 {dimension_numbers = #tpu.dot_dimension_numbers<[1], [0], [0], [1], [0, 0, 1, 1], [], []>} : vector<64x4xbf16>, vector<4x4xbf16>, vector<64x4xf32> -> vector<64x4xf32>
    %56 = arith.addf %50, %55 : vector<64x4xf32>
    %57 = vector.extract_strided_slice %4 {offsets = [1, 1, 0], sizes = [8, 8, 4], strides = [1, 1, 1]} : vector<10x10x4xbf16> to vector<8x8x4xbf16>
    %58 = vector.shape_cast %57 : vector<8x8x4xbf16> to vector<64x4xbf16>
    %c1_39 = arith.constant 1 : index
    %c2_40 = arith.constant 2 : index
    %c0_41 = arith.constant 0 : index
    %c0_42 = arith.constant 0 : index
    %59 = vector.load %arg3[%c1_39, %c2_40, %c0_41, %c0_42] : memref<4x4x4x4xbf16, #tpu.memory_space<vmem>>, vector<1x1x4x4xbf16>
    %60 = vector.shape_cast %59 : vector<1x1x4x4xbf16> to vector<4x4xbf16>
    %cst_43 = arith.constant dense<0.000000e+00> : vector<64x4xf32>
    %61 = tpu.matmul %58, %60, %cst_43 {dimension_numbers = #tpu.dot_dimension_numbers<[1], [0], [0], [1], [0, 0, 1, 1], [], []>} : vector<64x4xbf16>, vector<4x4xbf16>, vector<64x4xf32> -> vector<64x4xf32>
    %62 = arith.addf %56, %61 : vector<64x4xf32>
    %63 = vector.extract_strided_slice %4 {offsets = [1, 2, 0], sizes = [8, 8, 4], strides = [1, 1, 1]} : vector<10x10x4xbf16> to vector<8x8x4xbf16>
    %64 = vector.shape_cast %63 : vector<8x8x4xbf16> to vector<64x4xbf16>
    %c1_44 = arith.constant 1 : index
    %c3_45 = arith.constant 3 : index
    %c0_46 = arith.constant 0 : index
    %c0_47 = arith.constant 0 : index
    %65 = vector.load %arg3[%c1_44, %c3_45, %c0_46, %c0_47] : memref<4x4x4x4xbf16, #tpu.memory_space<vmem>>, vector<1x1x4x4xbf16>
    %66 = vector.shape_cast %65 : vector<1x1x4x4xbf16> to vector<4x4xbf16>
    %cst_48 = arith.constant dense<0.000000e+00> : vector<64x4xf32>
    %67 = tpu.matmul %64, %66, %cst_48 {dimension_numbers = #tpu.dot_dimension_numbers<[1], [0], [0], [1], [0, 0, 1, 1], [], []>} : vector<64x4xbf16>, vector<4x4xbf16>, vector<64x4xf32> -> vector<64x4xf32>
    %68 = arith.addf %62, %67 : vector<64x4xf32>
    %cst_49 = arith.constant dense<0.000000e+00> : vector<4xf32>
    %69 = vector.multi_reduction <add>, %68, %cst_49 [0] : vector<64x4xf32> to vector<4xf32>
    %70 = vector.shape_cast %69 : vector<4xf32> to vector<1x4xf32>
    %71 = arith.addf %34, %70 : vector<1x4xf32>
    %72 = arith.mulf %68, %68 : vector<64x4xf32>
    %cst_50 = arith.constant dense<0.000000e+00> : vector<4xf32>
    %73 = vector.multi_reduction <add>, %72, %cst_50 [0] : vector<64x4xf32> to vector<4xf32>
    %74 = vector.shape_cast %73 : vector<4xf32> to vector<1x4xf32>
    %75 = arith.addf %38, %74 : vector<1x4xf32>
    %76 = vector.shape_cast %68 : vector<64x4xf32> to vector<8x8x4xf32>
    %77 = arith.truncf %76 : vector<8x8x4xf32> to vector<8x8x4xbf16>
    %c0_51 = arith.constant 0 : index
    %c0_52 = arith.constant 0 : index
    %c1_53 = arith.constant 1 : index
    %c0_54 = arith.constant 0 : index
    %c0_55 = arith.constant 0 : index
    %78 = vector.load %arg4[%c0_51, %c0_52, %c1_53, %c0_54, %c0_55] : memref<1x8x4x8x4xbf16, #tpu.memory_space<vmem>>, vector<1x8x1x8x4xbf16>
    %79 = vector.shape_cast %78 : vector<1x8x1x8x4xbf16> to vector<8x8x4xbf16>
    %80 = vector.shape_cast %77 : vector<8x8x4xbf16> to vector<1x8x1x8x4xbf16>
    tpu.vector_store %arg4[%c0_51, %c0_52, %c1_53, %c0_54, %c0_55], %80 {strides = array<i32>} : memref<1x8x4x8x4xbf16, #tpu.memory_space<vmem>>, vector<1x8x1x8x4xbf16>,
    %cst_56 = arith.constant 0.000000e+00 : f32
    %81 = vector.broadcast %cst_56 : f32 to vector<64x4xf32>
    %82 = vector.extract_strided_slice %4 {offsets = [1, 0, 0], sizes = [8, 8, 4], strides = [1, 1, 1]} : vector<10x10x4xbf16> to vector<8x8x4xbf16>
    %83 = vector.shape_cast %82 : vector<8x8x4xbf16> to vector<64x4xbf16>
    %c2_57 = arith.constant 2 : index
    %c0_58 = arith.constant 0 : index
    %c0_59 = arith.constant 0 : index
    %c0_60 = arith.constant 0 : index
    %84 = vector.load %arg3[%c2_57, %c0_58, %c0_59, %c0_60] : memref<4x4x4x4xbf16, #tpu.memory_space<vmem>>, vector<1x1x4x4xbf16>
    %85 = vector.shape_cast %84 : vector<1x1x4x4xbf16> to vector<4x4xbf16>
    %cst_61 = arith.constant dense<0.000000e+00> : vector<64x4xf32>
    %86 = tpu.matmul %83, %85, %cst_61 {dimension_numbers = #tpu.dot_dimension_numbers<[1], [0], [0], [1], [0, 0, 1, 1], [], []>} : vector<64x4xbf16>, vector<4x4xbf16>, vector<64x4xf32> -> vector<64x4xf32>
    %87 = arith.addf %81, %86 : vector<64x4xf32>
    %88 = vector.extract_strided_slice %4 {offsets = [1, 1, 0], sizes = [8, 8, 4], strides = [1, 1, 1]} : vector<10x10x4xbf16> to vector<8x8x4xbf16>
    %89 = vector.shape_cast %88 : vector<8x8x4xbf16> to vector<64x4xbf16>
    %c2_62 = arith.constant 2 : index
    %c1_63 = arith.constant 1 : index
    %c0_64 = arith.constant 0 : index
    %c0_65 = arith.constant 0 : index
    %90 = vector.load %arg3[%c2_62, %c1_63, %c0_64, %c0_65] : memref<4x4x4x4xbf16, #tpu.memory_space<vmem>>, vector<1x1x4x4xbf16>
    %91 = vector.shape_cast %90 : vector<1x1x4x4xbf16> to vector<4x4xbf16>
    %cst_66 = arith.constant dense<0.000000e+00> : vector<64x4xf32>
    %92 = tpu.matmul %89, %91, %cst_66 {dimension_numbers = #tpu.dot_dimension_numbers<[1], [0], [0], [1], [0, 0, 1, 1], [], []>} : vector<64x4xbf16>, vector<4x4xbf16>, vector<64x4xf32> -> vector<64x4xf32>
    %93 = arith.addf %87, %92 : vector<64x4xf32>
    %94 = vector.extract_strided_slice %4 {offsets = [2, 0, 0], sizes = [8, 8, 4], strides = [1, 1, 1]} : vector<10x10x4xbf16> to vector<8x8x4xbf16>
    %95 = vector.shape_cast %94 : vector<8x8x4xbf16> to vector<64x4xbf16>
    %c2_67 = arith.constant 2 : index
    %c2_68 = arith.constant 2 : index
    %c0_69 = arith.constant 0 : index
    %c0_70 = arith.constant 0 : index
    %96 = vector.load %arg3[%c2_67, %c2_68, %c0_69, %c0_70] : memref<4x4x4x4xbf16, #tpu.memory_space<vmem>>, vector<1x1x4x4xbf16>
    %97 = vector.shape_cast %96 : vector<1x1x4x4xbf16> to vector<4x4xbf16>
    %cst_71 = arith.constant dense<0.000000e+00> : vector<64x4xf32>
    %98 = tpu.matmul %95, %97, %cst_71 {dimension_numbers = #tpu.dot_dimension_numbers<[1], [0], [0], [1], [0, 0, 1, 1], [], []>} : vector<64x4xbf16>, vector<4x4xbf16>, vector<64x4xf32> -> vector<64x4xf32>
    %99 = arith.addf %93, %98 : vector<64x4xf32>
    %100 = vector.extract_strided_slice %4 {offsets = [2, 1, 0], sizes = [8, 8, 4], strides = [1, 1, 1]} : vector<10x10x4xbf16> to vector<8x8x4xbf16>
    %101 = vector.shape_cast %100 : vector<8x8x4xbf16> to vector<64x4xbf16>
    %c2_72 = arith.constant 2 : index
    %c3_73 = arith.constant 3 : index
    %c0_74 = arith.constant 0 : index
    %c0_75 = arith.constant 0 : index
    %102 = vector.load %arg3[%c2_72, %c3_73, %c0_74, %c0_75] : memref<4x4x4x4xbf16, #tpu.memory_space<vmem>>, vector<1x1x4x4xbf16>
    %103 = vector.shape_cast %102 : vector<1x1x4x4xbf16> to vector<4x4xbf16>
    %cst_76 = arith.constant dense<0.000000e+00> : vector<64x4xf32>
    %104 = tpu.matmul %101, %103, %cst_76 {dimension_numbers = #tpu.dot_dimension_numbers<[1], [0], [0], [1], [0, 0, 1, 1], [], []>} : vector<64x4xbf16>, vector<4x4xbf16>, vector<64x4xf32> -> vector<64x4xf32>
    %105 = arith.addf %99, %104 : vector<64x4xf32>
    %cst_77 = arith.constant dense<0.000000e+00> : vector<4xf32>
    %106 = vector.multi_reduction <add>, %105, %cst_77 [0] : vector<64x4xf32> to vector<4xf32>
    %107 = vector.shape_cast %106 : vector<4xf32> to vector<1x4xf32>
    %108 = arith.addf %71, %107 : vector<1x4xf32>
    %109 = arith.mulf %105, %105 : vector<64x4xf32>
    %cst_78 = arith.constant dense<0.000000e+00> : vector<4xf32>
    %110 = vector.multi_reduction <add>, %109, %cst_78 [0] : vector<64x4xf32> to vector<4xf32>
    %111 = vector.shape_cast %110 : vector<4xf32> to vector<1x4xf32>
    %112 = arith.addf %75, %111 : vector<1x4xf32>
    %113 = vector.shape_cast %105 : vector<64x4xf32> to vector<8x8x4xf32>
    %114 = arith.truncf %113 : vector<8x8x4xf32> to vector<8x8x4xbf16>
    %c0_79 = arith.constant 0 : index
    %c0_80 = arith.constant 0 : index
    %c2_81 = arith.constant 2 : index
    %c0_82 = arith.constant 0 : index
    %c0_83 = arith.constant 0 : index
    %115 = vector.load %arg4[%c0_79, %c0_80, %c2_81, %c0_82, %c0_83] : memref<1x8x4x8x4xbf16, #tpu.memory_space<vmem>>, vector<1x8x1x8x4xbf16>
    %116 = vector.shape_cast %115 : vector<1x8x1x8x4xbf16> to vector<8x8x4xbf16>
    %117 = vector.shape_cast %114 : vector<8x8x4xbf16> to vector<1x8x1x8x4xbf16>
    tpu.vector_store %arg4[%c0_79, %c0_80, %c2_81, %c0_82, %c0_83], %117 {strides = array<i32>} : memref<1x8x4x8x4xbf16, #tpu.memory_space<vmem>>, vector<1x8x1x8x4xbf16>,
    %cst_84 = arith.constant 0.000000e+00 : f32
    %118 = vector.broadcast %cst_84 : f32 to vector<64x4xf32>
    %119 = vector.extract_strided_slice %4 {offsets = [1, 1, 0], sizes = [8, 8, 4], strides = [1, 1, 1]} : vector<10x10x4xbf16> to vector<8x8x4xbf16>
    %120 = vector.shape_cast %119 : vector<8x8x4xbf16> to vector<64x4xbf16>
    %c3_85 = arith.constant 3 : index
    %c0_86 = arith.constant 0 : index
    %c0_87 = arith.constant 0 : index
    %c0_88 = arith.constant 0 : index
    %121 = vector.load %arg3[%c3_85, %c0_86, %c0_87, %c0_88] : memref<4x4x4x4xbf16, #tpu.memory_space<vmem>>, vector<1x1x4x4xbf16>
    %122 = vector.shape_cast %121 : vector<1x1x4x4xbf16> to vector<4x4xbf16>
    %cst_89 = arith.constant dense<0.000000e+00> : vector<64x4xf32>
    %123 = tpu.matmul %120, %122, %cst_89 {dimension_numbers = #tpu.dot_dimension_numbers<[1], [0], [0], [1], [0, 0, 1, 1], [], []>} : vector<64x4xbf16>, vector<4x4xbf16>, vector<64x4xf32> -> vector<64x4xf32>
    %124 = arith.addf %118, %123 : vector<64x4xf32>
    %125 = vector.extract_strided_slice %4 {offsets = [1, 2, 0], sizes = [8, 8, 4], strides = [1, 1, 1]} : vector<10x10x4xbf16> to vector<8x8x4xbf16>
    %126 = vector.shape_cast %125 : vector<8x8x4xbf16> to vector<64x4xbf16>
    %c3_90 = arith.constant 3 : index
    %c1_91 = arith.constant 1 : index
    %c0_92 = arith.constant 0 : index
    %c0_93 = arith.constant 0 : index
    %127 = vector.load %arg3[%c3_90, %c1_91, %c0_92, %c0_93] : memref<4x4x4x4xbf16, #tpu.memory_space<vmem>>, vector<1x1x4x4xbf16>
    %128 = vector.shape_cast %127 : vector<1x1x4x4xbf16> to vector<4x4xbf16>
    %cst_94 = arith.constant dense<0.000000e+00> : vector<64x4xf32>
    %129 = tpu.matmul %126, %128, %cst_94 {dimension_numbers = #tpu.dot_dimension_numbers<[1], [0], [0], [1], [0, 0, 1, 1], [], []>} : vector<64x4xbf16>, vector<4x4xbf16>, vector<64x4xf32> -> vector<64x4xf32>
    %130 = arith.addf %124, %129 : vector<64x4xf32>
    %131 = vector.extract_strided_slice %4 {offsets = [2, 1, 0], sizes = [8, 8, 4], strides = [1, 1, 1]} : vector<10x10x4xbf16> to vector<8x8x4xbf16>
    %132 = vector.shape_cast %131 : vector<8x8x4xbf16> to vector<64x4xbf16>
    %c3_95 = arith.constant 3 : index
    %c2_96 = arith.constant 2 : index
    %c0_97 = arith.constant 0 : index
    %c0_98 = arith.constant 0 : index
    %133 = vector.load %arg3[%c3_95, %c2_96, %c0_97, %c0_98] : memref<4x4x4x4xbf16, #tpu.memory_space<vmem>>, vector<1x1x4x4xbf16>
    %134 = vector.shape_cast %133 : vector<1x1x4x4xbf16> to vector<4x4xbf16>
    %cst_99 = arith.constant dense<0.000000e+00> : vector<64x4xf32>
    %135 = tpu.matmul %132, %134, %cst_99 {dimension_numbers = #tpu.dot_dimension_numbers<[1], [0], [0], [1], [0, 0, 1, 1], [], []>} : vector<64x4xbf16>, vector<4x4xbf16>, vector<64x4xf32> -> vector<64x4xf32>
    %136 = arith.addf %130, %135 : vector<64x4xf32>
    %137 = vector.extract_strided_slice %4 {offsets = [2, 2, 0], sizes = [8, 8, 4], strides = [1, 1, 1]} : vector<10x10x4xbf16> to vector<8x8x4xbf16>
    %138 = vector.shape_cast %137 : vector<8x8x4xbf16> to vector<64x4xbf16>
    %c3_100 = arith.constant 3 : index
    %c3_101 = arith.constant 3 : index
    %c0_102 = arith.constant 0 : index
    %c0_103 = arith.constant 0 : index
    %139 = vector.load %arg3[%c3_100, %c3_101, %c0_102, %c0_103] : memref<4x4x4x4xbf16, #tpu.memory_space<vmem>>, vector<1x1x4x4xbf16>
    %140 = vector.shape_cast %139 : vector<1x1x4x4xbf16> to vector<4x4xbf16>
    %cst_104 = arith.constant dense<0.000000e+00> : vector<64x4xf32>
    %141 = tpu.matmul %138, %140, %cst_104 {dimension_numbers = #tpu.dot_dimension_numbers<[1], [0], [0], [1], [0, 0, 1, 1], [], []>} : vector<64x4xbf16>, vector<4x4xbf16>, vector<64x4xf32> -> vector<64x4xf32>
    %142 = arith.addf %136, %141 : vector<64x4xf32>
    %cst_105 = arith.constant dense<0.000000e+00> : vector<4xf32>
    %143 = vector.multi_reduction <add>, %142, %cst_105 [0] : vector<64x4xf32> to vector<4xf32>
    %144 = vector.shape_cast %143 : vector<4xf32> to vector<1x4xf32>
    %145 = arith.addf %108, %144 : vector<1x4xf32>
    %146 = arith.mulf %142, %142 : vector<64x4xf32>
    %cst_106 = arith.constant dense<0.000000e+00> : vector<4xf32>
    %147 = vector.multi_reduction <add>, %146, %cst_106 [0] : vector<64x4xf32> to vector<4xf32>
    %148 = vector.shape_cast %147 : vector<4xf32> to vector<1x4xf32>
    %149 = arith.addf %112, %148 : vector<1x4xf32>
    %150 = vector.shape_cast %142 : vector<64x4xf32> to vector<8x8x4xf32>
    %151 = arith.truncf %150 : vector<8x8x4xf32> to vector<8x8x4xbf16>
    %c0_107 = arith.constant 0 : index
    %c0_108 = arith.constant 0 : index
    %c3_109 = arith.constant 3 : index
    %c0_110 = arith.constant 0 : index
    %c0_111 = arith.constant 0 : index
    %152 = vector.load %arg4[%c0_107, %c0_108, %c3_109, %c0_110, %c0_111] : memref<1x8x4x8x4xbf16, #tpu.memory_space<vmem>>, vector<1x8x1x8x4xbf16>
    %153 = vector.shape_cast %152 : vector<1x8x1x8x4xbf16> to vector<8x8x4xbf16>
    %154 = vector.shape_cast %151 : vector<8x8x4xbf16> to vector<1x8x1x8x4xbf16>
    tpu.vector_store %arg4[%c0_107, %c0_108, %c3_109, %c0_110, %c0_111], %154 {strides = array<i32>} : memref<1x8x4x8x4xbf16, #tpu.memory_space<vmem>>, vector<1x8x1x8x4xbf16>,
    %c0_112 = arith.constant 0 : index
    %c0_113 = arith.constant 0 : index
    %c0_114 = arith.constant 0 : index
    %c0_115 = arith.constant 0 : index
    %155 = vector.load %arg5[%c0_112, %c0_113, %c0_114, %c0_115] : memref<1x1x2x4xf32, #tpu.memory_space<vmem>>, vector<1x1x1x4xf32>
    %156 = vector.shape_cast %155 : vector<1x1x1x4xf32> to vector<1x4xf32>
    %157 = vector.shape_cast %145 : vector<1x4xf32> to vector<1x1x1x4xf32>
    tpu.vector_store %arg5[%c0_112, %c0_113, %c0_114, %c0_115], %157 {strides = array<i32>} : memref<1x1x2x4xf32, #tpu.memory_space<vmem>>, vector<1x1x1x4xf32>,
    %c0_116 = arith.constant 0 : index
    %c0_117 = arith.constant 0 : index
    %c1_118 = arith.constant 1 : index
    %c0_119 = arith.constant 0 : index
    %158 = vector.load %arg5[%c0_116, %c0_117, %c1_118, %c0_119] : memref<1x1x2x4xf32, #tpu.memory_space<vmem>>, vector<1x1x1x4xf32>
    %159 = vector.shape_cast %158 : vector<1x1x1x4xf32> to vector<1x4xf32>
    %160 = vector.shape_cast %149 : vector<1x4xf32> to vector<1x1x1x4xf32>
    tpu.vector_store %arg5[%c0_116, %c0_117, %c1_118, %c0_119], %160 {strides = array<i32>} : memref<1x1x2x4xf32, #tpu.memory_space<vmem>>, vector<1x1x1x4xf32>,
    return
  }
  func.func @transform_0(%arg0: i32, %arg1: i32) -> (i32, i32, i32, i32) {
    %c0_i32 = arith.constant 0 : i32
    %c0_i32_0 = arith.constant 0 : i32
    %c0_i32_1 = arith.constant 0 : i32
    %c0_i32_2 = arith.constant 0 : i32
    return %arg0, %c0_i32, %c0_i32_0, %c0_i32_1 : i32, i32, i32, i32
  }
  func.func @transform_1(%arg0: i32, %arg1: i32) -> (i32, i32, i32, i32) {
    %c0_i32 = arith.constant 0 : i32
    %c0_i32_0 = arith.constant 0 : i32
    %c0_i32_1 = arith.constant 0 : i32
    %c0_i32_2 = arith.constant 0 : i32
    %c0_i32_3 = arith.constant 0 : i32
    return %c0_i32, %c0_i32_0, %c0_i32_1, %c0_i32_2 : i32, i32, i32, i32
  }
  func.func @transform_2(%arg0: i32, %arg1: i32) -> (i32, i32, i32, i32, i32) {
    %c0_i32 = arith.constant 0 : i32
    %c0_i32_0 = arith.constant 0 : i32
    %c0_i32_1 = arith.constant 0 : i32
    %c0_i32_2 = arith.constant 0 : i32
    return %arg0, %arg1, %c0_i32, %c0_i32_0, %c0_i32_1 : i32, i32, i32, i32, i32
  }
  func.func @transform_3(%arg0: i32, %arg1: i32) -> (i32, i32, i32, i32) {
    %c0_i32 = arith.constant 0 : i32
    %c0_i32_0 = arith.constant 0 : i32
    %c0_i32_1 = arith.constant 0 : i32
    return %arg0, %arg1, %c0_i32, %c0_i32_0 : i32, i32, i32, i32
  }
}

module attributes {stable_mosaic.version = 11 : i64} {
  func.func @_fuse_kernel(%arg0: i32, %arg1: i32, %arg2: memref<1x8x128xf32, #tpu.memory_space<vmem>>, %arg3: memref<1x8x128xbf16, #tpu.memory_space<vmem>>, %arg4: memref<1x8x128xf32, #tpu.memory_space<vmem>>, %arg5: memref<1x8x128xf32, #tpu.memory_space<vmem>>, %arg6: memref<1x128xf32, #tpu.memory_space<vmem>>, %arg7: memref<1x128xf32, #tpu.memory_space<vmem>>, %arg8: memref<1x8x128xf32, #tpu.memory_space<vmem>>, %arg9: memref<1x8x128xf32, #tpu.memory_space<vmem>>) attributes {dimension_semantics = [#tpu.dimension_semantics<parallel>, #tpu.dimension_semantics<parallel>], iteration_bounds = array<i64: 2, 1>, scalar_prefetch = 0 : i64, scratch_operands = 0 : i64, tpu.core_type = #tpu.core_type<tc>, window_params = [{transform_indices = @transform_0, window_bounds = array<i64: 1, 8, 128>}, {transform_indices = @transform_1, window_bounds = array<i64: 1, 8, 128>}, {transform_indices = @transform_2, window_bounds = array<i64: 1, 8, 128>}, {transform_indices = @transform_3, window_bounds = array<i64: 1, 8, 128>}, {pipeline_mode = #tpu.pipeline_mode<synchronous>, transform_indices = @transform_4, window_bounds = array<i64: 1, 128>}, {pipeline_mode = #tpu.pipeline_mode<synchronous>, transform_indices = @transform_5, window_bounds = array<i64: 1, 128>}, {transform_indices = @transform_6, window_bounds = array<i64: 1, 8, 128>}, {transform_indices = @transform_7, window_bounds = array<i64: 1, 8, 128>}]} {
    %c0 = arith.constant 0 : index
    %c0_0 = arith.constant 0 : index
    %c0_1 = arith.constant 0 : index
    %0 = vector.load %arg2[%c0, %c0_0, %c0_1] : memref<1x8x128xf32, #tpu.memory_space<vmem>>, vector<1x8x128xf32>
    %1 = vector.shape_cast %0 : vector<1x8x128xf32> to vector<8x128xf32>
    %c0_2 = arith.constant 0 : index
    %c0_3 = arith.constant 0 : index
    %c0_4 = arith.constant 0 : index
    %2 = vector.load %arg4[%c0_2, %c0_3, %c0_4] : memref<1x8x128xf32, #tpu.memory_space<vmem>>, vector<1x8x128xf32>
    %3 = vector.shape_cast %2 : vector<1x8x128xf32> to vector<8x128xf32>
    %4 = arith.mulf %1, %3 : vector<8x128xf32>
    %cst = arith.constant 0.000000e+00 : f32
    %5 = vector.broadcast %cst : f32 to vector<8x128xf32>
    %6 = arith.cmpf oge, %4, %5 : vector<8x128xf32>
    %cst_5 = arith.constant 2.000000e-01 : f32
    %7 = vector.broadcast %cst_5 : f32 to vector<8x128xf32>
    %8 = arith.mulf %7, %4 : vector<8x128xf32>
    %9 = arith.select %6, %4, %8 : vector<8x128xi1>, vector<8x128xf32>
    %c0_6 = arith.constant 0 : index
    %c0_7 = arith.constant 0 : index
    %c0_8 = arith.constant 0 : index
    %10 = vector.load %arg8[%c0_6, %c0_7, %c0_8] : memref<1x8x128xf32, #tpu.memory_space<vmem>>, vector<1x8x128xf32>
    %11 = vector.shape_cast %10 : vector<1x8x128xf32> to vector<8x128xf32>
    %12 = vector.shape_cast %9 : vector<8x128xf32> to vector<1x8x128xf32>
    tpu.vector_store %arg8[%c0_6, %c0_7, %c0_8], %12 {strides = array<i32>} : memref<1x8x128xf32, #tpu.memory_space<vmem>>, vector<1x8x128xf32>,
    %c0_9 = arith.constant 0 : index
    %c0_10 = arith.constant 0 : index
    %c0_11 = arith.constant 0 : index
    %13 = vector.load %arg3[%c0_9, %c0_10, %c0_11] : memref<1x8x128xbf16, #tpu.memory_space<vmem>>, vector<1x8x128xbf16>
    %14 = vector.shape_cast %13 : vector<1x8x128xbf16> to vector<8x128xbf16>
    %15 = arith.extf %14 : vector<8x128xbf16> to vector<8x128xf32>
    %c0_12 = arith.constant 0 : index
    %c0_13 = arith.constant 0 : index
    %16 = vector.load %arg6[%c0_12, %c0_13] : memref<1x128xf32, #tpu.memory_space<vmem>>, vector<1x128xf32>
    %17 = vector.broadcast %16 : vector<1x128xf32> to vector<8x128xf32>
    %18 = arith.mulf %15, %17 : vector<8x128xf32>
    %c0_14 = arith.constant 0 : index
    %c0_15 = arith.constant 0 : index
    %19 = vector.load %arg7[%c0_14, %c0_15] : memref<1x128xf32, #tpu.memory_space<vmem>>, vector<1x128xf32>
    %20 = vector.broadcast %19 : vector<1x128xf32> to vector<8x128xf32>
    %21 = arith.addf %18, %20 : vector<8x128xf32>
    %c0_16 = arith.constant 0 : index
    %c0_17 = arith.constant 0 : index
    %c0_18 = arith.constant 0 : index
    %22 = vector.load %arg5[%c0_16, %c0_17, %c0_18] : memref<1x8x128xf32, #tpu.memory_space<vmem>>, vector<1x8x128xf32>
    %23 = vector.shape_cast %22 : vector<1x8x128xf32> to vector<8x128xf32>
    %24 = arith.mulf %21, %23 : vector<8x128xf32>
    %cst_19 = arith.constant 0.000000e+00 : f32
    %25 = vector.broadcast %cst_19 : f32 to vector<8x128xf32>
    %26 = arith.cmpf oge, %24, %25 : vector<8x128xf32>
    %cst_20 = arith.constant 2.000000e-01 : f32
    %27 = vector.broadcast %cst_20 : f32 to vector<8x128xf32>
    %28 = arith.mulf %27, %24 : vector<8x128xf32>
    %29 = arith.select %26, %24, %28 : vector<8x128xi1>, vector<8x128xf32>
    %c0_21 = arith.constant 0 : index
    %c0_22 = arith.constant 0 : index
    %c0_23 = arith.constant 0 : index
    %30 = vector.load %arg9[%c0_21, %c0_22, %c0_23] : memref<1x8x128xf32, #tpu.memory_space<vmem>>, vector<1x8x128xf32>
    %31 = vector.shape_cast %30 : vector<1x8x128xf32> to vector<8x128xf32>
    %32 = vector.shape_cast %29 : vector<8x128xf32> to vector<1x8x128xf32>
    tpu.vector_store %arg9[%c0_21, %c0_22, %c0_23], %32 {strides = array<i32>} : memref<1x8x128xf32, #tpu.memory_space<vmem>>, vector<1x8x128xf32>,
    return
  }
  func.func @transform_0(%arg0: i32, %arg1: i32) -> (i32, i32, i32) {
    %c0_i32 = arith.constant 0 : i32
    %c0_i32_0 = arith.constant 0 : i32
    return %arg0, %arg1, %c0_i32 : i32, i32, i32
  }
  func.func @transform_1(%arg0: i32, %arg1: i32) -> (i32, i32, i32) {
    %c0_i32 = arith.constant 0 : i32
    %c0_i32_0 = arith.constant 0 : i32
    return %arg0, %arg1, %c0_i32 : i32, i32, i32
  }
  func.func @transform_2(%arg0: i32, %arg1: i32) -> (i32, i32, i32) {
    %c0_i32 = arith.constant 0 : i32
    %c0_i32_0 = arith.constant 0 : i32
    return %arg0, %arg1, %c0_i32 : i32, i32, i32
  }
  func.func @transform_3(%arg0: i32, %arg1: i32) -> (i32, i32, i32) {
    %c0_i32 = arith.constant 0 : i32
    %c0_i32_0 = arith.constant 0 : i32
    return %arg0, %arg1, %c0_i32 : i32, i32, i32
  }
  func.func @transform_4(%arg0: i32, %arg1: i32) -> (i32, i32) {
    %c0_i32 = arith.constant 0 : i32
    %c0_i32_0 = arith.constant 0 : i32
    %c0_i32_1 = arith.constant 0 : i32
    return %c0_i32, %c0_i32_0 : i32, i32
  }
  func.func @transform_5(%arg0: i32, %arg1: i32) -> (i32, i32) {
    %c0_i32 = arith.constant 0 : i32
    %c0_i32_0 = arith.constant 0 : i32
    %c0_i32_1 = arith.constant 0 : i32
    return %c0_i32, %c0_i32_0 : i32, i32
  }
  func.func @transform_6(%arg0: i32, %arg1: i32) -> (i32, i32, i32) {
    %c0_i32 = arith.constant 0 : i32
    %c0_i32_0 = arith.constant 0 : i32
    return %arg0, %arg1, %c0_i32 : i32, i32, i32
  }
  func.func @transform_7(%arg0: i32, %arg1: i32) -> (i32, i32, i32) {
    %c0_i32 = arith.constant 0 : i32
    %c0_i32_0 = arith.constant 0 : i32
    return %arg0, %arg1, %c0_i32 : i32, i32, i32
  }
}

</mosaic_0001>

<bundles_post_ra>
// kernel: tile.18
= control target key start
LH: loop header
LB: loop body
LE: loop exit
PB: predicated region body
PF: predicated region fallthrough
CT: control target
= control target key end

     0   :  { %s40_s0 = inlined_call_operand.vmem [shape: f32[4], index: 0, kind: input, shape index: {}]   ;;  %s41_s1 = inlined_call_operand.vmem [shape: f32[32,4], index: 1, kind: output, shape index: {}]  }
   0x1   :  { %v4_v0 = vld [vmem:[%s40_s0] ss:$0 sm:$0xff] }
   0x2   :  { %5 = vst [vmem:[%s41_s1] sm:$0xff] %v4_v0 }
   0x3   :  { %12 = vst [vmem:[%s41_s1 + $0x8] sm:$0xff] %v4_v0 }
   0x4   :  { %13 = vst [vmem:[%s41_s1 + $0x10] sm:$0xff] %v4_v0 }
   0x5   :  { %14 = vst [vmem:[%s41_s1 + $0x18] sm:$0xff] %v4_v0 }

// kernel: tile.19
= control target key start
LH: loop header
LB: loop body
LE: loop exit
PB: predicated region body
PF: predicated region fallthrough
CT: control target
= control target key end

     0   :  { %s259_s10 = smov 124   ;;  %s260_s11 = smov 116   ;;  %vm3_vm0 = vcmask 31744   ;;  %vm9_vm1 = vcmask 1048544   ;;  %vm15_vm2 = vcmask 1015744   ;;  %vm21_vm3 = vcmask 982944   ;;  %s399_s0 = inlined_call_operand.vmem [shape: f32[32,4], index: 0, kind: input, shape index: {}]   ;;  %s400_s1 = inlined_call_operand.vmem [shape: f32[1,128], index: 1, kind: output, shape index: {}]  }
   0x1   :  { %v197_v0 = vld [vmem:[%s399_s0 + $0x1f] sm:$0x1]   ;;  %v199_v1 = vld [vmem:[%s399_s0 + $0x1d] sm:$0x1]   ;;  %v201_v2 = vld [vmem:[%s399_s0 + $0x1b] sm:$0x1]  }
   0x2   :  { %7 = vrot.lane.b32.xlu0 %v197_v0, %s259_s10  ;;  %19 = vrot.lane.b32.xlu1 %v199_v1, %s260_s11  ;;  %s261_s14 = smov 108   ;;  %v198_v3 = vld [vmem:[%s399_s0 + $0x1e] sm:$0x1]   ;;  %v200_v4 = vld [vmem:[%s399_s0 + $0x1c] sm:$0x1]   ;;  %s262_s19 = smov 120  }
   0x3   :  { %31 = vrot.lane.b32.xlu2 %v201_v2, %s261_s14  ;;  %s263_s20 = smov 112   ;;  %v202_v5 = vld [vmem:[%s399_s0 + $0x1a] sm:$0x1]   ;;  %s264_s23 = smov 104   ;;  %v203_v6 = vld [vmem:[%s399_s0 + $0x19] sm:$0x1]  }
   0x4   :  { %v204_v7 = vld [vmem:[%s399_s0 + $0x18] sm:$0x1]   ;;  %s265_s28 = smov 100   ;;  %s266_s29 = smov 96   ;;  %v205_v8 = vld [vmem:[%s399_s0 + $0x17] sm:$0x1]  }
   0x5   :  { %s267_s3 = smov 92   ;;  %v206_v9 = vld [vmem:[%s399_s0 + $0x16] sm:$0x1]   ;;  %v207_v10 = vld [vmem:[%s399_s0 + $0x15] sm:$0x1]   ;;  %s268_s8 = smov 88  }
   0x6   :  { %s269_s9 = smov 84   ;;  %v208_v11 = vld [vmem:[%s399_s0 + $0x14] sm:$0x1]   ;;  %s270_s12 = smov 80   ;;  %v209_v12 = vld [vmem:[%s399_s0 + $0x13] sm:$0x1]  }
   0x7   :  { %v210_v13 = vld [vmem:[%s399_s0 + $0x12] sm:$0x1]   ;;  %s271_s17 = smov 76   ;;  %s272_s18 = smov 72   ;;  %v211_v14 = vld [vmem:[%s399_s0 + $0x11] sm:$0x1]  }
   0x8   :  { %s273_s21 = smov 68   ;;  %v212_v15 = vld [vmem:[%s399_s0 + $0x10] sm:$0x1]   ;;  %v213_v16 = vld [vmem:[%s399_s0 + $0xf] sm:$0x1]   ;;  %s274_s26 = smov 64  }
   0x9   :  { %s275_s27 = smov 60   ;;  %v214_v17 = vld [vmem:[%s399_s0 + $0xe] sm:$0x1]   ;;  %s276_s30 = smov 56   ;;  %v215_v18 = vld [vmem:[%s399_s0 + $0xd] sm:$0x1]  }
   0xa   :  { %13 = vrot.lane.b32.xlu0 %v198_v3, %s262_s19  ;;  %25 = vrot.lane.b32.xlu1 %v200_v4, %s263_s20  ;;  %v216_v19 = vld [vmem:[%s399_s0 + $0xc] sm:$0x1]   ;;  %s277_s6 = smov 52   ;;  %s278_s7 = smov 48   ;;  %v217_v20 = vld [vmem:[%s399_s0 + $0xb] sm:$0x1]  }
   0xb   :  { %37 = vrot.lane.b32.xlu2 %v202_v5, %s264_s23  ;;  %s279_s10 = smov 44   ;;  %v218_v21 = vld [vmem:[%s399_s0 + $0xa] sm:$0x1]   ;;  %v219_v22 = vld [vmem:[%s399_s0 + $0x9] sm:$0x1]   ;;  %s280_s15 = smov 40  }
   0xc   :  { %s281_s16 = smov 36   ;;  %v220_v23 = vld [vmem:[%s399_s0 + $0x8] sm:$0x1]   ;;  %s282_s19 = smov 32   ;;  %v221_v24 = vld [vmem:[%s399_s0 + $0x7] sm:$0x1]  }
   0xd   :  { %v222_v25 = vld [vmem:[%s399_s0 + $0x6] sm:$0x1]   ;;  %s283_s24 = smov 28   ;;  %s284_s25 = smov 24   ;;  %v223_v26 = vld [vmem:[%s399_s0 + $0x5] sm:$0x1]  }
   0xe   :  { %v224_v27 = vld [vmem:[%s399_s0 + $0x4] sm:$0x1]   ;;  %v225_v28 = vld [vmem:[%s399_s0 + $0x3] sm:$0x1]   ;;  %s286_s4 = smov 16   ;;  %s287_s5 = smov 12  }
   0xf   :  { %v226_v29 = vld [vmem:[%s399_s0 + $0x2] sm:$0x1]   ;;  %v227_v30 = vld [vmem:[%s399_s0 + $0x1] sm:$0x1]   ;;  %s289_s11 = smov 4   ;;  %vm27_vm4 = vcmask 950144  }
  0x10   :  { %v2_v31 = vld [vmem:[%s399_s0] sm:$0x1]   ;;  %vm33_vm5 = vcmask 917344   ;;  %vm39_vm6 = vcmask 884544   ;;  %vm45_vm7 = vcmask 851744   ;;  %vm51_vm8 = vcmask 818944  }
  0x11   :  { %4 = vst.msk [vmem:[#allocation0] sm:$0x1] %vm3_vm0, %v2_v31   ;;  %vm57_vm9 = vcmask 786144   ;;  %vm63_vm10 = vcmask 753344   ;;  %vm69_vm11 = vcmask 720544   ;;  %vm75_vm12 = vcmask 687744  }
  0x12   :  { %43 = vrot.lane.b32.xlu0 %v203_v6, %s265_s28  ;;  %49 = vrot.lane.b32.xlu1 %v204_v7, %s266_s29  ;;  %s285_s28 = smov 20   ;;  %vm81_vm13 = vcmask 654944   ;;  %vm87_vm14 = vcmask 622144   ;;  %vm93_vm15 = vcmask 589344   ;;  %vm99_vm0 = vcmask 556544  }
  0x13   :  { %55 = vrot.lane.b32.xlu2 %v205_v8, %s267_s3 }
  0x1a   :  { %61 = vrot.lane.b32.xlu0 %v206_v9, %s268_s8  ;;  %67 = vrot.lane.b32.xlu1 %v207_v10, %s269_s9  ;;  %s288_s8 = smov 8  }
  0x1b   :  { %73 = vrot.lane.b32.xlu2 %v208_v11, %s270_s12 }
  0x22   :  { %79 = vrot.lane.b32.xlu0 %v209_v12, %s271_s17  ;;  %85 = vrot.lane.b32.xlu1 %v210_v13, %s272_s18 }
  0x23   :  { %91 = vrot.lane.b32.xlu2 %v211_v14, %s273_s21 }
  0x2a   :  { %97 = vrot.lane.b32.xlu0 %v212_v15, %s274_s26  ;;  %103 = vrot.lane.b32.xlu1 %v213_v16, %s275_s27 }
  0x2b   :  { %109 = vrot.lane.b32.xlu2 %v214_v17, %s276_s30 }
  0x32   :  { %115 = vrot.lane.b32.xlu0 %v215_v18, %s277_s6  ;;  %121 = vrot.lane.b32.xlu1 %v216_v19, %s278_s7 }
  0x33   :  { %127 = vrot.lane.b32.xlu2 %v217_v20, %s279_s10 }
  0x3a   :  { %133 = vrot.lane.b32.xlu0 %v218_v21, %s280_s15  ;;  %139 = vrot.lane.b32.xlu1 %v219_v22, %s281_s16 }
  0x3b   :  { %145 = vrot.lane.b32.xlu2 %v220_v23, %s282_s19 }
  0x42   :  { %151 = vrot.lane.b32.xlu0 %v221_v24, %s283_s24  ;;  %157 = vrot.lane.b32.xlu1 %v222_v25, %s284_s25 }
  0x43   :  { %163 = vrot.lane.b32.xlu2 %v223_v26, %s285_s28 }
  0x4a   :  { %169 = vrot.lane.b32.xlu0 %v224_v27, %s286_s4  ;;  %175 = vrot.lane.b32.xlu1 %v225_v28, %s287_s5 }
  0x4b   :  { %181 = vrot.lane.b32.xlu2 %v226_v29, %s288_s8 }
  0x52   :  { %187 = vrot.lane.b32.xlu0 %v227_v30, %s289_s11 }
  0x5d   :  { %v32_v32 = vpop.permute.xlu2 %31  }
  0x65   :  { %v38_v33 = vpop.permute.xlu2 %37  }
  0x6d   :  { %v56_v34 = vpop.permute.xlu2 %55  }
  0x74   :  { %v8_v35 = vpop.permute.xlu0 %7   ;;  %v20_v36 = vpop.permute.xlu1 %19  }
  0x75   :  { %10 = vst.msk [vmem:[#allocation0] sm:$0x1] %vm9_vm1, %v8_v35   ;;  %v74_v37 = vpop.permute.xlu2 %73   ;;  %vm105_vm1 = vcmask 523744  }
  0x7c   :  { %v14_v38 = vpop.permute.xlu0 %13   ;;  %v26_v39 = vpop.permute.xlu1 %25  }
  0x7d   :  { %16 = vst.msk [vmem:[#allocation0] sm:$0x1] %vm15_vm2, %v14_v38   ;;  %v92_v40 = vpop.permute.xlu2 %91   ;;  %vm111_vm2 = vcmask 490944  }
  0x7e   :  { %22 = vst.msk [vmem:[#allocation0] sm:$0x1] %vm21_vm3, %v20_v36   ;;  %vm117_vm3 = vcmask 458144  }
  0x7f   :  { %28 = vst.msk [vmem:[#allocation0] sm:$0x1] %vm27_vm4, %v26_v39   ;;  %vm123_vm4 = vcmask 425344  }
  0x80   :  { %34 = vst.msk [vmem:[#allocation0] sm:$0x1] %vm33_vm5, %v32_v32   ;;  %vm129_vm5 = vcmask 392544  }
  0x81   :  { %40 = vst.msk [vmem:[#allocation0] sm:$0x1] %vm39_vm6, %v38_v33   ;;  %vm135_vm6 = vcmask 359744  }
  0x84   :  { %v44_v41 = vpop.permute.xlu0 %43   ;;  %v50_v42 = vpop.permute.xlu1 %49  }
  0x85   :  { %46 = vst.msk [vmem:[#allocation0] sm:$0x1] %vm45_vm7, %v44_v41   ;;  %v110_v43 = vpop.permute.xlu2 %109   ;;  %vm141_vm7 = vcmask 326944  }
  0x86   :  { %52 = vst.msk [vmem:[#allocation0] sm:$0x1] %vm51_vm8, %v50_v42   ;;  %vm147_vm8 = vcmask 294144  }
  0x87   :  { %58 = vst.msk [vmem:[#allocation0] sm:$0x1] %vm57_vm9, %v56_v34   ;;  %vm153_vm9 = vcmask 261344  }
  0x8c   :  { %v62_v44 = vpop.permute.xlu0 %61   ;;  %v68_v45 = vpop.permute.xlu1 %67  }
  0x8d   :  { %64 = vst.msk [vmem:[#allocation0] sm:$0x1] %vm63_vm10, %v62_v44   ;;  %v128_v46 = vpop.permute.xlu2 %127   ;;  %vm159_vm10 = vcmask 228544  }
  0x8e   :  { %70 = vst.msk [vmem:[#allocation0] sm:$0x1] %vm69_vm11, %v68_v45   ;;  %vm165_vm11 = vcmask 195744  }
  0x8f   :  { %76 = vst.msk [vmem:[#allocation0] sm:$0x1] %vm75_vm12, %v74_v37   ;;  %vm171_vm12 = vcmask 162944  }
  0x94   :  { %v80_v47 = vpop.permute.xlu0 %79   ;;  %v86_v48 = vpop.permute.xlu1 %85  }
  0x95   :  { %82 = vst.msk [vmem:[#allocation0] sm:$0x1] %vm81_vm13, %v80_v47   ;;  %v146_v49 = vpop.permute.xlu2 %145   ;;  %vm177_vm13 = vcmask 130144  }
  0x96   :  { %88 = vst.msk [vmem:[#allocation0] sm:$0x1] %vm87_vm14, %v86_v48   ;;  %vm183_vm14 = vcmask 97344  }
  0x97   :  { %94 = vst.msk [vmem:[#allocation0] sm:$0x1] %vm93_vm15, %v92_v40   ;;  %vm189_vm15 = vcmask 64544  }
  0x9c   :  { %v98_v50 = vpop.permute.xlu0 %97   ;;  %v104_v51 = vpop.permute.xlu1 %103  }
  0x9d   :  { %100 = vst.msk [vmem:[#allocation0] sm:$0x1] %vm99_vm0, %v98_v50   ;;  %v164_v52 = vpop.permute.xlu2 %163  }
  0x9e   :  { %106 = vst.msk [vmem:[#allocation0] sm:$0x1] %vm105_vm1, %v104_v51  }
  0x9f   :  { %112 = vst.msk [vmem:[#allocation0] sm:$0x1] %vm111_vm2, %v110_v43  }
  0xa4   :  { %v116_v53 = vpop.permute.xlu0 %115   ;;  %v122_v54 = vpop.permute.xlu1 %121  }
  0xa5   :  { %118 = vst.msk [vmem:[#allocation0] sm:$0x1] %vm117_vm3, %v116_v53   ;;  %v182_v55 = vpop.permute.xlu2 %181  }
  0xa6   :  { %124 = vst.msk [vmem:[#allocation0] sm:$0x1] %vm123_vm4, %v122_v54  }
  0xa7   :  { %130 = vst.msk [vmem:[#allocation0] sm:$0x1] %vm129_vm5, %v128_v46  }
  0xac   :  { %v134_v56 = vpop.permute.xlu0 %133   ;;  %v140_v57 = vpop.permute.xlu1 %139  }
  0xad   :  { %136 = vst.msk [vmem:[#allocation0] sm:$0x1] %vm135_vm6, %v134_v56  }
  0xae   :  { %142 = vst.msk [vmem:[#allocation0] sm:$0x1] %vm141_vm7, %v140_v57  }
  0xaf   :  { %148 = vst.msk [vmem:[#allocation0] sm:$0x1] %vm147_vm8, %v146_v49  }
  0xb4   :  { %v152_v58 = vpop.permute.xlu0 %151   ;;  %v158_v59 = vpop.permute.xlu1 %157  }
  0xb5   :  { %154 = vst.msk [vmem:[#allocation0] sm:$0x1] %vm153_vm9, %v152_v58  }
  0xb6   :  { %160 = vst.msk [vmem:[#allocation0] sm:$0x1] %vm159_vm10, %v158_v59  }
  0xb7   :  { %166 = vst.msk [vmem:[#allocation0] sm:$0x1] %vm165_vm11, %v164_v52  }
  0xbc   :  { %v170_v60 = vpop.permute.xlu0 %169   ;;  %v176_v61 = vpop.permute.xlu1 %175  }
  0xbd   :  { %172 = vst.msk [vmem:[#allocation0] sm:$0x1] %vm171_vm12, %v170_v60  }
  0xbe   :  { %178 = vst.msk [vmem:[#allocation0] sm:$0x1] %vm177_vm13, %v176_v61  }
  0xbf   :  { %184 = vst.msk [vmem:[#allocation0] sm:$0x1] %vm183_vm14, %v182_v55  }
  0xc4   :  { %v188_v62 = vpop.permute.xlu0 %187  }
  0xc5   :  { %190 = vst.msk [vmem:[#allocation0] sm:$0x1] %vm189_vm15, %v188_v62  }
  0xcc   :  { %v193_v63 = vld [vmem:[#allocation0] sm:$0x1] }
  0xcd   :  { %196 = vst [vmem:[%s400_s1] sm:$0x1] %v193_v63 }

// kernel: up_adaptive_conv.2
= control target key start
LH: loop header
LB: loop body
LE: loop exit
PB: predicated region body
PF: predicated region fallthrough
CT: control target
= control target key end

     0   :  { %s1796_s12 = smov 0   ;;  %s1798_s13 = smov 0   ;;  %s2430_s0 = inlined_call_operand.vmem [shape: bf16[2,10,10,4], index: 0, kind: input, shape index: {}]   ;;  %s2431_s1 = inlined_call_operand.vmem [shape: bf16[4,4,4,4], index: 1, kind: input, shape index: {}]   ;;  %s2432_s2 = inlined_call_operand.vmem [shape: bf16[2,8,4,8,4], index: 2, kind: output, shape index: {0}]   ;;  %s2433_s3 = inlined_call_operand.vmem [shape: f32[2,1,2,4], index: 3, kind: output, shape index: {1}]  }
   0x1   :  { %s1800_s14 = smov 0  }
   0x2 LB: > { %s26_s15 = sadd.s32 1, %s1770_s13  ;;  %p1606_p0 = scmp.ge.s32.totalorder %s1774_s14, 1  ;;  %s1774_s14 = sphi %s1800_s14, %s14_s14   ;;  %s1770_s13 = sphi %s1798_s13, %s2439_s13   ;;  %s1766_s12 = sphi %s1796_s12, %s2438_s12  }
   0x3   : > { %p28_p1 = scmp.ge.s32.totalorder %s26_s15, 2  ;;  %p156_p2 = scmp.lt.s32.totalorder %s1774_s14, 3 }
   0x5   : > { %s2441_s15 = smov (%p28_p1, %s26_s15), 0  ;;  %p157_p3 = pnand %p1606_p0, %p156_p2 }
   0x6   : > { %p192_p4 = scmp.lt.s32.totalorder (!%p157_p3), %s1766_s12, 1 }
   0x7   : > { %160 = sbr.rel (%p157_p3) target bundleno = 436 (0x1b4), region = 28 }
   0xc   : > { %vm383_vm0 = vcmask 1041408   ;;  %v1620_v0 = vld [vmem:[%s2431_s1 + $0x4] sm:$0x3]  ;;  %v240_v1 = vld [vmem:[%s2431_s1] sm:$0x3]  ;;  %s2443_s12 = smov (!%p192_p4, %s1766_s12), 1 }
   0xd   : > { %v501_v2 = vsel %vm383_vm0, %v1620_v0, 0  ;;  %v449_v3 = vsel %vm383_vm0, %v240_v1, 0  ;;  %v1611_v4 = vld [vmem:[%s2431_s1 + $0x2] sm:$0x3]  ;;  %v1625_v6 = vld [vmem:[%s2431_s1 + $0x6] sm:$0x3] }
   0xe   : > { %510 = vmatpush.bf16.msra.mxu2 %v501_v2  ;;  %458 = vmatpush.bf16.msra.mxu1 %v449_v3  ;;  %v385_v5 = vsel %vm383_vm0, %v1611_v4, 0  ;;  %v1648_v7 = vld [vmem:[%s2431_s1 + $0xc] sm:$0x3]  ;;  %v574_v8 = vsel %vm383_vm0, %v1625_v6, 0  ;;  %s1727_s26 = smul.u32 80, %s2443_s12  ;;  %vm370_vm1 = vcmask 31744  }
   0xf   : > { %394 = vmatpush.bf16.msra.mxu0 %v385_v5  ;;  %v820_v9 = vsel %vm383_vm0, %v1648_v7, 0  ;;  %583 = vmatpush.bf16.msra.mxu3 %v574_v8  ;;  %v1654_v10 = vld [vmem:[%s2431_s1 + $0xe] sm:$0x3]  ;;  %v1639_v11 = vld [vmem:[%s2431_s1 + $0xa] sm:$0x3]  ;;  %vm692_vm5 = vcmask 1042432  }
  0x10   : > { %v884_v12 = vsel %vm383_vm0, %v1654_v10, 0  ;;  %v754_v13 = vsel %vm383_vm0, %v1639_v11, 0  ;;  %v1630_v14 = vld [vmem:[%s2431_s1 + $0x8] sm:$0x3]  ;;  %s1851_s8 = scalar_lea.vmem %s2430_s0, %s1727_s26  ;;  %vm241_vm2 = vsmask.f32 3328 }
  0x11   : > { %v786_v15 = vsel %vm383_vm0, %v1630_v14, 0  ;;  %v1855_v16 = vld [vmem:[%s1851_s8 + $0x8] sm:$0xf]  ;;  %v1858_v17 = vld [vmem:[%s1851_s8 + $0x10] sm:$0xf]  ;;  %vm693_vm6 = vcmask 1046532  }
  0x12   : > { %829 = vmatpush.bf16.msrb.mxu2 %v820_v9  ;;  %v1861_v18 = vld [vmem:[%s1851_s8] sm:$0xf]  ;;  %795 = vmatpush.bf16.msrb.mxu1 %v786_v15  ;;  %v273_v19 = vshrl.u32 %v1858_v17, 16  ;;  %v276_v20 = vshll.u32 %v1858_v17, 16  ;;  %v425_v21 = vunpack.c.l.b16 %v1855_v16  ;;  %v426_v22 = vunpack.c.l.b16 %v1858_v17  ;;  %v1868_v23 = vld [vmem:[%s1851_s8 + $0x4] sm:$0x1]  ;;  %vm2008_vm7 = vmor %vm692_vm5, %vm693_vm6 }
  0x13   : > { %893 = vmatpush.bf16.msrb.mxu3 %v884_v12  ;;  %763 = vmatpush.bf16.msrb.mxu0 %v754_v13  ;;  %v424_v24 = vunpack.c.l.b16 %v1861_v18  ;;  %v1872_v25 = vld [vmem:[%s1851_s8 + $0xc] sm:$0x1]  ;;  %vm242_vm3 = vsmask.f32 7440  ;;  %v245_v29 = vshrl.u32 %v1861_v18, 16  ;;  %v248_v32 = vshll.u32 %v1861_v18, 16 }
  0x14   : > { %v275_v26 = vrot.slane %v273_v19, 4  ;;  %v278_v27 = vrot.slane %v276_v20, 5  ;;  %v1876_v28 = vpack.c.b16 %v426_v22, %v425_v21  ;;  %v1880_v30 = vld [vmem:[%s1851_s8 + $0x14] sm:$0x1]  ;;  %v254_v33 = vshll.u32 %v1868_v23, 16  ;;  %vm1899_vm4 = vmor %vm241_vm2, %vm242_vm3  ;;  %s1726_s29 = sshll.u32 %s2443_s12, 7 }
  0x15   : > { %v432_v31 = vpack.c.b16 %v425_v21, %v424_v24  ;;  %v259_v34 = vshrl.u32 %v1855_v16, 16  ;;  %v1886_v35 = vld [vmem:[%s1851_s8 + $0x18] sm:$0xf]  ;;  %v247_v36 = vrot.slane %v245_v29, 4  ;;  %v262_v37 = vshll.u32 %v1855_v16, 16  ;;  %s2184_s5 = scalar_lea.vmem %s2432_s2, %s1726_s29  ;;  %s1610_s6 = sshll.u32 %s2443_s12, 1 }
  0x16   : > { %1621 = vmatmul.msk.bf16.vlgmr.msra.gmra.mxu2 %vm370_vm1, %v1876_v28  ;;  %v268_v38 = vshll.u32 %v1872_v25, 16  ;;  %v1893_v39 = vld [vmem:[%s1851_s8 + $0x20] sm:$0xf]  ;;  %v250_v40 = vrot.slane %v248_v32, 5  ;;  %v256_v41 = vrot.slane %v254_v33, 5  ;;  %v279_v45 = vor.u32 %v278_v27, %v275_v26  ;;  %s214_s9 = scalar_lea.vmem %s2433_s3, %s1610_s6 }
  0x17   : > { %1616 = vmatmul.msk.bf16.vlgmr.msra.gmra.mxu1 %vm370_vm1, %v432_v31  ;;  %v261_v42 = vrot.slane %v259_v34, 4  ;;  %v264_v43 = vrot.slane %v262_v37, 5  ;;  %v282_v46 = vshll.u32 %v1880_v30, 16  ;;  %v287_v49 = vshrl.u32 %v1886_v35, 16  ;;  %v1912_v1 = vld [vmem:[%s1851_s8 + $0x1c] sm:$0x1] }
  0x18   : > { %v270_v44 = vrot.slane %v268_v38, 5  ;;  %v251_v48 = vor.u32 %v250_v40, %v247_v36  ;;  %v290_v50 = vshll.u32 %v1886_v35, 16  ;;  %v301_v51 = vshrl.u32 %v1893_v39, 16  ;;  %v1915_v2 = vld [vmem:[%s1851_s8 + $0x24] sm:$0x1] }
  0x19   : > { %v265_v52 = vor.u32 %v264_v43, %v261_v42  ;;  %v280_v53 = vrot.slane %v279_v45, 4  ;;  %v284_v54 = vrot.slane %v282_v46, 5  ;;  %v304_v55 = vshll.u32 %v1893_v39, 16  ;;  %v1938_v26 = vld [vmem:[%s1851_s8 + $0x28] sm:$0xf] }
  0x1a   : > { %v252_v56 = vrot.slane %v251_v48, 4  ;;  %v289_v57 = vrot.slane %v287_v49, 4  ;;  %v292_v58 = vrot.slane %v290_v50, 5  ;;  %v303_v61 = vrot.slane %v301_v51, 4  ;;  %v1941_v27 = vld [vmem:[%s1851_s8 + $0x30] sm:$0xf] }
  0x1b   : > { %v266_v59 = vrot.slane %v265_v52, 4  ;;  %v285_v60 = vsel %vm1899_vm4, %v280_v53, %v284_v54  ;;  %v306_v62 = vrot.slane %v304_v55, 5  ;;  %v427_v5 = vunpack.c.l.b16 %v1886_v35  ;;  %v1958_v43 = vld [vmem:[%s1851_s8 + $0x2c] sm:$0x1] }
  0x1c   : > { %v257_v63 = vsel %vm1899_vm4, %v252_v56, %v256_v41  ;;  %v360_v0 = vunpack.c.l.b16 %v285_v60  ;;  %v428_v6 = vunpack.c.l.b16 %v1893_v39  ;;  %v293_v8 = vor.u32 %v292_v58, %v289_v57  ;;  %v1983_v58 = vld [vmem:[%s1851_s8 + $0x38] sm:$0xf] }
  0x1d   : > { %v271_v3 = vsel %vm1899_vm4, %v266_v59, %v270_v44  ;;  %v358_v4 = vunpack.c.l.b16 %v257_v63  ;;  %v296_v9 = vshll.u32 %v1912_v1, 16  ;;  %v307_v10 = vor.u32 %v306_v62, %v303_v61  ;;  %v1961_v44 = vld [vmem:[%s1851_s8 + $0x34] sm:$0x1] }
  0x1e   : > { %v359_v7 = vunpack.c.l.b16 %v271_v3  ;;  %v310_v11 = vshll.u32 %v1915_v2, 16  ;;  %v1927_v14 = vpack.c.b16 %v428_v6, %v427_v5  ;;  %v1935_v15 = vpack.c.b16 %v427_v5, %v426_v22  ;;  %v1990_v3 = vld [vmem:[%s1851_s8 + $0x40] sm:$0xf] }
  0x1f   : > { %v294_v19 = vrot.slane %v293_v8, 4  ;;  %v298_v20 = vrot.slane %v296_v9, 5  ;;  %v308_v21 = vrot.slane %v307_v10, 4  ;;  %v315_v29 = vshrl.u32 %v1938_v26, 16 }
  0x20   : > { %v1923_v12 = vpack.c.b16 %v359_v7, %v358_v4  ;;  %v1925_v13 = vpack.c.b16 %v360_v0, %v359_v7  ;;  %v312_v24 = vrot.slane %v310_v11, 5  ;;  %v318_v22 = vshll.u32 %v1938_v26, 16 }
  0x21   : > { %v299_v31 = vsel %vm1899_vm4, %v294_v19, %v298_v20  ;;  %v329_v33 = vshrl.u32 %v1941_v27, 16  ;;  %v332_v34 = vshll.u32 %v1941_v27, 16  ;;  %v317_v38 = vrot.slane %v315_v29, 4 }
  0x22   : > { %1612 = vmatmul.msk.bf16.vlgmr.msra.gmra.mxu0 %vm370_vm1, %v1923_v12  ;;  %1626 = vmatmul.msk.bf16.vlgmr.msra.gmra.mxu3 %vm370_vm1, %v1925_v13  ;;  %v313_v32 = vsel %vm1899_vm4, %v308_v21, %v312_v24  ;;  %v361_v36 = vunpack.c.l.b16 %v299_v31  ;;  %v320_v40 = vrot.slane %v318_v22, 5  ;;  %v429_v45 = vunpack.c.l.b16 %v1938_v26  ;;  %v2018_v31 = vld [vmem:[%s1851_s8 + $0x3c] sm:$0x1] }
  0x23   : > { %v1955_v37 = vunpack.c.l.b16 %v313_v32  ;;  %v331_v41 = vrot.slane %v329_v33, 4  ;;  %v334_v42 = vrot.slane %v332_v34, 5  ;;  %v430_v46 = vunpack.c.l.b16 %v1941_v27  ;;  %v2021_v32 = vld [vmem:[%s1851_s8 + $0x44] sm:$0x1] }
  0x24   : > { %v1965_v48 = vpack.c.b16 %v361_v36, %v360_v0  ;;  %v321_v50 = vor.u32 %v320_v40, %v317_v38  ;;  %v324_v51 = vshll.u32 %v1958_v43, 16  ;;  %v338_v53 = vshll.u32 %v1961_v44, 16 }
  0x25   : > { %v1968_v49 = vpack.c.b16 %v1955_v37, %v361_v36  ;;  %v335_v52 = vor.u32 %v334_v42, %v331_v41  ;;  %v1974_v54 = vpack.c.b16 %v430_v46, %v429_v45  ;;  %v1980_v55 = vpack.c.b16 %v429_v45, %v428_v6 }
  0x26   : > { %1622 = vmatmul.msk.bf16.gmra.mxu2 %vm370_vm1, %v1927_v14  ;;  %v322_v56 = vrot.slane %v321_v50, 4  ;;  %v326_v57 = vrot.slane %v324_v51, 5  ;;  %v340_v60 = vrot.slane %v338_v53, 5  ;;  %v1632_v61 = vrot.slane %v1855_v16, 9 }
  0x27   : > { %1617 = vmatmul.msk.bf16.gmra.mxu1 %vm370_vm1, %v1935_v15  ;;  %v336_v59 = vrot.slane %v335_v52, 4  ;;  %v1631_v62 = vrot.slane %v1861_v18, 9  ;;  %v697_v63 = vrot.slane %v1868_v23, 5  ;;  %v701_v0 = vrot.slane %v1872_v25, 5  ;;  %v1677_v18 = vld [vmem:[%s2431_s1 + $0x14] sm:$0x3] }
  0x28   : > { %v343_v4 = vshrl.u32 %v1983_v58, 16  ;;  %v346_v5 = vshll.u32 %v1983_v58, 16  ;;  %v327_v16 = vsel %vm1899_vm4, %v322_v56, %v326_v57  ;;  %v541_v25 = vshrl.u32 %v1990_v3, 16 }
  0x29   : > { %v341_v23 = vsel %vm1899_vm4, %v336_v59, %v340_v60  ;;  %v544_v6 = vshll.u32 %v1990_v3, 16  ;;  %v1069_v7 = vsel %vm383_vm0, %v1677_v18, 0  ;;  %v1633_v9 = vrot.slane %v1858_v17, 9 }
  0x2a   : > { %1078 = vmatpush.bf16.msra.mxu2 %v1069_v7  ;;  %v698_v10 = vsel %vm2008_vm7, %v1631_v62, %v697_v63  ;;  %v702_v11 = vsel %vm2008_vm7, %v1632_v61, %v701_v0  ;;  %v345_v19 = vrot.slane %v343_v4, 4  ;;  %v348_v20 = vrot.slane %v346_v5, 5  ;;  %v1682_v62 = vld [vmem:[%s2431_s1 + $0x16] sm:$0x3]  ;;  %v1668_v63 = vld [vmem:[%s2431_s1 + $0x12] sm:$0x3] }
  0x2b   : > { %v729_v21 = vunpack.c.l.b16 %v698_v10  ;;  %v730_v24 = vunpack.c.l.b16 %v702_v11  ;;  %v363_v29 = vunpack.c.l.b16 %v327_v16  ;;  %v364_v22 = vunpack.c.l.b16 %v341_v23  ;;  %v1667_v0 = vld [vmem:[%s2431_s1 + $0x10] sm:$0x3] }
  0x2c   : > { %v543_v33 = vrot.slane %v541_v25, 4  ;;  %v546_v34 = vrot.slane %v544_v6, 5  ;;  %v705_v36 = vrot.slane %v1880_v30, 5  ;;  %v431_v38 = vunpack.c.l.b16 %v1983_v58 }
  0x2d   : > { %v737_v17 = vpack.c.b16 %v730_v24, %v729_v21  ;;  %v483_v40 = vunpack.c.l.b16 %v1990_v3  ;;  %v349_v41 = vor.u32 %v348_v20, %v345_v19  ;;  %v352_v42 = vshll.u32 %v2018_v31, 16 }
  0x2e   : > { %v550_v45 = vshll.u32 %v2021_v32, 16  ;;  %v706_v50 = vsel %vm2008_vm7, %v1633_v9, %v705_v36  ;;  %v2031_v51 = vpack.c.b16 %v363_v29, %v1955_v37  ;;  %v2033_v52 = vpack.c.b16 %v364_v22, %v363_v29 }
  0x2f   : > { %v731_v53 = vunpack.c.l.b16 %v706_v50  ;;  %v547_v56 = vor.u32 %v546_v34, %v543_v33  ;;  %v2039_v57 = vpack.c.b16 %v483_v40, %v431_v38  ;;  %v350_v59 = vrot.slane %v349_v41, 4 }
  0x30   : > { %v354_v60 = vrot.slane %v352_v42, 5  ;;  %v552_v61 = vrot.slane %v550_v45, 5  ;;  %v2047_v37 = vpack.c.b16 %v431_v38, %v430_v46  ;;  %v1130_v5 = vsel %vm383_vm0, %v1682_v62, 0 }
  0x31   : > { %v2035_v30 = vpack.c.b16 %v731_v53, %v730_v24  ;;  %v548_v4 = vrot.slane %v547_v56, 4  ;;  %v997_v16 = vsel %vm383_vm0, %v1668_v63, 0  ;;  %v1029_v46 = vsel %vm383_vm0, %v1667_v0, 0  ;;  %1139 = vmatpush.bf16.msra.mxu3 %v1130_v5  ;;  %v1696_v56 = vld [vmem:[%s2431_s1 + $0x1a] sm:$0x3] }
  0x32   : > { %1613 = vmatmul.msk.bf16.gmra.mxu0 %vm370_vm1, %v1965_v48  ;;  %1627 = vmatmul.msk.bf16.gmra.mxu3 %vm370_vm1, %v1968_v49  ;;  %v1634_v18 = vrot.slane %v1886_v35, 9  ;;  %v709_v23 = vrot.slane %v1912_v1, 5  ;;  %v355_v25 = vsel %vm1899_vm4, %v350_v59, %v354_v60  ;;  %v1635_v20 = vrot.slane %v1893_v39, 9  ;;  %v1695_v59 = vld [vmem:[%s2431_s1 + $0x18] sm:$0x3] }
  0x33   : > { %1006 = vmatpush.bf16.msra.mxu0 %v997_v16  ;;  %1038 = vmatpush.bf16.msra.mxu1 %v1029_v46  ;;  %v553_v6 = vsel %vm1899_vm4, %v548_v4, %v552_v61  ;;  %v365_v10 = vunpack.c.l.b16 %v355_v25  ;;  %v713_v35 = vrot.slane %v1915_v2, 5  ;;  %v1636_v39 = vrot.slane %v1938_v26, 9 }
  0x34   : > { %v710_v7 = vsel %vm2008_vm7, %v1634_v18, %v709_v23  ;;  %v2073_v11 = vunpack.c.l.b16 %v553_v6  ;;  %v717_v2 = vrot.slane %v1958_v43, 5  ;;  %v1637_v38 = vrot.slane %v1941_v27, 9 }
  0x35   : > { %v732_v9 = vunpack.c.l.b16 %v710_v7  ;;  %v714_v1 = vsel %vm2008_vm7, %v1635_v20, %v713_v35  ;;  %v2081_v21 = vpack.c.b16 %v365_v10, %v364_v22  ;;  %v721_v41 = vrot.slane %v1961_v44, 5 }
  0x36   : > { %1623 = vmatmul.msk.bf16.gmra.mxu2 %vm370_vm1, %v1974_v54  ;;  %v2084_v24 = vpack.c.b16 %v2073_v11, %v365_v10  ;;  %v733_v29 = vunpack.c.l.b16 %v714_v1  ;;  %v718_v22 = vsel %vm2008_vm7, %v1636_v39, %v717_v2  ;;  %v725_v26 = vrot.slane %v2018_v31, 5 }
  0x37   : > { %1618 = vmatmul.msk.bf16.gmra.mxu1 %vm370_vm1, %v1980_v55  ;;  %v2075_v19 = vpack.c.b16 %v732_v9, %v731_v53  ;;  %v734_v34 = vunpack.c.l.b16 %v718_v22  ;;  %v722_v42 = vsel %vm2008_vm7, %v1637_v38, %v721_v41  ;;  %v1653_v31 = vrot.slane %v1990_v3, 9  ;;  %v1711_v53 = vld [vmem:[%s2431_s1 + $0x1e] sm:$0x3] }
  0x38   : > { %v2086_v33 = vpack.c.b16 %v733_v29, %v732_v9  ;;  %v735_v45 = vunpack.c.l.b16 %v722_v42  ;;  %v862_v60 = vrot.slane %v2021_v32, 5  ;;  %v1361_v61 = vsel %vm383_vm0, %v1711_v53, 0 }
  0x39   : > { %v2100_v36 = vpack.c.b16 %v734_v34, %v733_v29  ;;  %v1243_v62 = vsel %vm383_vm0, %v1696_v56, 0  ;;  %v1275_v63 = vsel %vm383_vm0, %v1695_v59, 0  ;;  %vm673_vm8 = vcmask 27648  }
  0x3a   : > { %v2106_v50 = vpack.c.b16 %v735_v45, %v734_v34  ;;  %v2157_v0 = vsel %vm2008_vm7, %v1653_v31, %v862_v60  ;;  %vm1469_vm9 = vcmask 24576  }
  0x3b   : > { %v866_v32 = vunpack.c.l.b16 %v2157_v0 }
  0x42   : > { %1614 = vmatmul.msk.bf16.gmra.mxu0 %vm370_vm1, %v2031_v51  ;;  %1628 = vmatmul.msk.bf16.gmra.mxu3 %vm370_vm1, %v2033_v52 }
  0x46   : > { %1624 = vmatmul.msk.bf16.gmra.mxu2 %vm370_vm1, %v2039_v57 }
  0x47   : > { %1619 = vmatmul.msk.bf16.gmra.mxu1 %vm370_vm1, %v2047_v37 }
  0x52   : > { %1615 = vmatmul.msk.bf16.gmra.mxu0 %vm370_vm1, %v2081_v21  ;;  %1629 = vmatmul.msk.bf16.gmra.mxu3 %vm370_vm1, %v2084_v24 }
  0x56   : > { %1649 = vmatmul.msk.bf16.vlgmr.msrb.gmra.mxu2 %vm370_vm1, %v1925_v13 }
  0x57   : > { %1644 = vmatmul.msk.bf16.vlgmr.msrb.gmra.mxu1 %vm370_vm1, %v1923_v12  ;;  %v1638_v12 = vrot.slane %v1983_v58, 9  ;;  %v1705_v58 = vld [vmem:[%s2431_s1 + $0x1c] sm:$0x3] }
  0x58   : > { %1284 = vmatpush.bf16.msrb.mxu1 %v1275_v63 }
  0x59   : > { %v726_v27 = vsel %vm2008_vm7, %v1638_v12, %v725_v26 }
  0x5a   : > { %v736_v43 = vunpack.c.l.b16 %v726_v27 }
  0x5c   : > { %v2119_v44 = vpack.c.b16 %v736_v43, %v735_v45  ;;  %v2162_v4 = vpack.c.b16 %v866_v32, %v736_v43 }
  0x62   : > { %1640 = vmatmul.msk.bf16.vlgmr.msrb.gmra.mxu0 %vm370_vm1, %v737_v17  ;;  %1655 = vmatmul.msk.bf16.vlgmr.msrb.gmra.mxu3 %vm370_vm1, %v2035_v30  ;;  %v1309_v17 = vsel %vm383_vm0, %v1705_v58, 0 }
  0x63   : > { %1318 = vmatpush.bf16.msrb.mxu2 %v1309_v17  ;;  %1370 = vmatpush.bf16.msrb.mxu3 %v1361_v61  ;;  %v2199_v17 = vld [vmem:[%s1851_s8 + $0x48] sm:$0xf] }
  0x64   : > { %1252 = vmatpush.bf16.msrb.mxu0 %v1243_v62  ;;  %v1109_v60 = vshrl.u32 %v2199_v17, 16  ;;  %v1112_v61 = vshll.u32 %v2199_v17, 16 }
  0x66   : > { %1650 = vmatmul.msk.bf16.gmra.mxu2 %vm370_vm1, %v1968_v49 }
  0x67   : > { %1645 = vmatmul.msk.bf16.gmra.mxu1 %vm370_vm1, %v1965_v48 }
  0x72   : > { %1641 = vmatmul.msk.bf16.gmra.mxu0 %vm370_vm1, %v2075_v19  ;;  %1656 = vmatmul.msk.bf16.gmra.mxu3 %vm370_vm1, %v2086_v33 }
  0x76   : > { %1651 = vmatmul.msk.bf16.gmra.mxu2 %vm370_vm1, %v2033_v52 }
  0x77   : > { %1646 = vmatmul.msk.bf16.gmra.mxu1 %vm370_vm1, %v2031_v51 }
  0x82   : > { %1642 = vmatmul.msk.bf16.gmra.mxu0 %vm370_vm1, %v2100_v36  ;;  %1657 = vmatmul.msk.bf16.gmra.mxu3 %vm370_vm1, %v2106_v50 }
  0x86   : > { %1652 = vmatmul.msk.bf16.gmra.mxu2 %vm370_vm1, %v2084_v24 }
  0x87   : > { %1647 = vmatmul.msk.bf16.gmra.mxu1 %vm370_vm1, %v2081_v21 }
  0x92   : > { %1643 = vmatmul.msk.bf16.gmra.mxu0 %vm370_vm1, %v2119_v44  ;;  %1658 = vmatmul.msk.bf16.gmra.mxu3 %vm370_vm1, %v2162_v4 }
  0x94   : > { %v460_v5 = vpop.f32.mrf.mxu1 }
  0x96   : > { %1678 = vmatmul.msk.bf16.vlgmr.msra.gmra.mxu2 %vm370_vm1, %v1935_v15 }
  0x97   : > { %1673 = vmatmul.msk.bf16.vlgmr.msra.gmra.mxu1 %vm370_vm1, %v1876_v28 }
  0x99   : > { %v512_v16 = vpop.f32.mrf.mxu2 }
  0x9c   : > { %v462_v46 = vpop.f32.mrf.mxu1 }
  0x9f   : > { %v396_v18 = vpop.f32.mrf.mxu0 }
  0xa0   : > { %v461_v23 = vadd.f32 %v460_v5, %v396_v18 }
  0xa1   : > { %v514_v25 = vpop.f32.mrf.mxu2 }
  0xa2   : > { %1669 = vmatmul.msk.bf16.vlgmr.msra.gmra.mxu0 %vm370_vm1, %v1925_v13  ;;  %1683 = vmatmul.msk.bf16.vlgmr.msra.gmra.mxu3 %vm370_vm1, %v1965_v48  ;;  %v532_v6 = vadd.f32 %v512_v16, %v461_v23 }
  0xa4   : > { %v465_v7 = vpop.f32.mrf.mxu1 }
  0xa5   : > { %v585_v9 = vpop.f32.mrf.mxu3 }
  0xa6   : > { %1679 = vmatmul.msk.bf16.gmra.mxu2 %vm370_vm1, %v1980_v55  ;;  %v605_v15 = vadd.f32 %v585_v9, %v532_v6  ;;  %v1114_v6 = vrot.slane %v1112_v61, 5  ;;  %v2212_v9 = vld [vmem:[%s1851_s8 + $0x4c] sm:$0x1] }
  0xa7   : > { %1674 = vmatmul.msk.bf16.gmra.mxu1 %vm370_vm1, %v1927_v14  ;;  %v398_v28 = vpop.f32.mrf.mxu0 }
  0xa8   : > { %v665_v10 = vpack.c.bf16 %v605_v15, %v605_v15  ;;  %v463_v20 = vadd.f32 %v462_v46, %v398_v28  ;;  %v635_v39 = vmul.f32 %v605_v15, %v605_v15  ;;  %v613_v14 = vsel %vm370_vm1, %v605_v15, 0.0 }
  0xa9   : > { %v517_v35 = vpop.f32.mrf.mxu2  ;;  %v1063_v28 = vunpack.c.l.b16 %v2199_v17 }
  0xaa   : > { %674 = vst.msk [vmem:[%s2184_s5] sm:$0xf] %vm673_vm8, %v665_v10  ;;  %v533_v55 = vadd.f32 %v514_v25, %v463_v20  ;;  %v643_v26 = vsel %vm370_vm1, %v635_v39, 0.0 }
  0xac   : > { %v467_v1 = vpop.f32.mrf.mxu1 }
  0xad   : > { %v587_v29 = vpop.f32.mrf.mxu3 }
  0xae   : > { %v606_v2 = vadd.f32 %v587_v29, %v533_v55 }
  0xaf   : > { %v401_v22 = vpop.f32.mrf.mxu0 }
  0xb0   : > { %v614_v34 = vsel %vm370_vm1, %v606_v2, 0.0  ;;  %v636_v38 = vmul.f32 %v606_v2, %v606_v2  ;;  %v666_v41 = vpack.c.bf16 %v606_v2, %v606_v2  ;;  %v466_v42 = vadd.f32 %v465_v7, %v401_v22 }
  0xb1   : > { %v519_v45 = vpop.f32.mrf.mxu2  ;;  %v615_v12 = vadd.f32 %v614_v34, %v613_v14  ;;  %v1064_v34 = vpack.c.b16 %v1063_v28, %v483_v40 }
  0xb2   : > { %v644_v27 = vsel %vm370_vm1, %v636_v38, 0.0  ;;  %675 = vst.msk [vmem:[%s2184_s5 + $0x10] sm:$0xf] %vm673_vm8, %v666_v41  ;;  %1670 = vmatmul.msk.bf16.gmra.mxu0 %vm370_vm1, %v1968_v49  ;;  %1684 = vmatmul.msk.bf16.gmra.mxu3 %vm370_vm1, %v2031_v51  ;;  %v534_v43 = vadd.f32 %v517_v35, %v466_v42 }
  0xb3   : > { %v645_v58 = vadd.f32 %v644_v27, %v643_v26 }
  0xb4   : > { %v470_v31 = vpop.f32.mrf.mxu1 }
  0xb5   : > { %v590_v53 = vpop.f32.mrf.mxu3 }
  0xb6   : > { %1680 = vmatmul.msk.bf16.gmra.mxu2 %vm370_vm1, %v2047_v37  ;;  %v607_v56 = vadd.f32 %v590_v53, %v534_v43 }
  0xb7   : > { %1675 = vmatmul.msk.bf16.gmra.mxu1 %vm370_vm1, %v1974_v54  ;;  %v403_v59 = vpop.f32.mrf.mxu0  ;;  %v1111_v54 = vrot.slane %v1109_v60, 4 }
  0xb8   : > { %v616_v62 = vsel %vm370_vm1, %v607_v56, 0.0  ;;  %v637_v63 = vmul.f32 %v607_v56, %v607_v56  ;;  %v667_v5 = vpack.c.bf16 %v607_v56, %v607_v56  ;;  %v468_v16 = vadd.f32 %v467_v1, %v403_v59 }
  0xb9   : > { %v522_v46 = vpop.f32.mrf.mxu2  ;;  %v617_v18 = vadd.f32 %v616_v62, %v615_v12  ;;  %v1115_v35 = vor.u32 %v1114_v6, %v1111_v54  ;;  %v1118_v1 = vshll.u32 %v2212_v9, 16 }
  0xba   : > { %v646_v23 = vsel %vm370_vm1, %v637_v63, 0.0  ;;  %676 = vst.msk [vmem:[%s2184_s5 + $0x20] sm:$0xf] %vm673_vm8, %v667_v5  ;;  %v535_v7 = vadd.f32 %v519_v45, %v468_v16 }
  0xbb   : > { %v647_v37 = vadd.f32 %v646_v23, %v645_v58  ;;  %v1116_v12 = vrot.slane %v1115_v35, 4  ;;  %v1120_v26 = vrot.slane %v1118_v1, 5 }
  0xbc   : > { %v472_v25 = vpop.f32.mrf.mxu1 }
  0xbd   : > { %v592_v15 = vpop.f32.mrf.mxu3  ;;  %v1121_v43 = vsel %vm1899_vm4, %v1116_v12, %v1120_v26 }
  0xbe   : > { %v608_v10 = vadd.f32 %v592_v15, %v535_v7  ;;  %v1124_v62 = vunpack.c.l.b16 %v1121_v43 }
  0xbf   : > { %v406_v20 = vpop.f32.mrf.mxu0 }
  0xc0   : > { %v618_v55 = vsel %vm370_vm1, %v608_v10, 0.0  ;;  %v638_v29 = vmul.f32 %v608_v10, %v608_v10  ;;  %v668_v39 = vpack.c.bf16 %v608_v10, %v608_v10  ;;  %v471_v2 = vadd.f32 %v470_v31, %v406_v20 }
  0xc1   : > { %v524_v14 = vpop.f32.mrf.mxu2  ;;  %v619_v22 = vadd.f32 %v618_v55, %v617_v18  ;;  %v2236_v47 = vpack.c.b16 %v1124_v62, %v2073_v11 }
  0xc2   : > { %v648_v38 = vsel %vm370_vm1, %v638_v29, 0.0  ;;  %677 = vst.msk [vmem:[%s2184_s5 + $0x30] sm:$0xf] %vm673_vm8, %v668_v39  ;;  %1671 = vmatmul.msk.bf16.gmra.mxu0 %vm370_vm1, %v2033_v52  ;;  %1685 = vmatmul.msk.bf16.gmra.mxu3 %vm370_vm1, %v2081_v21  ;;  %v536_v41 = vadd.f32 %v522_v46, %v471_v2 }
  0xc3   : > { %v649_v42 = vadd.f32 %v648_v38, %v647_v37 }
  0xc4   : > { %v475_v45 = vpop.f32.mrf.mxu1 }
  0xc5   : > { %v595_v27 = vpop.f32.mrf.mxu3 }
  0xc6   : > { %1681 = vmatmul.msk.bf16.gmra.mxu2 %vm370_vm1, %v1064_v34  ;;  %v609_v3 = vadd.f32 %v595_v27, %v536_v41 }
  0xc7   : > { %1676 = vmatmul.msk.bf16.gmra.mxu1 %vm370_vm1, %v2039_v57  ;;  %v408_v40 = vpop.f32.mrf.mxu0 }
  0xc8   : > { %v620_v58 = vsel %vm370_vm1, %v609_v3, 0.0  ;;  %v639_v31 = vmul.f32 %v609_v3, %v609_v3  ;;  %v669_v53 = vpack.c.bf16 %v609_v3, %v609_v3  ;;  %v473_v56 = vadd.f32 %v472_v25, %v408_v40 }
  0xc9   : > { %v527_v59 = vpop.f32.mrf.mxu2  ;;  %v621_v60 = vadd.f32 %v620_v58, %v619_v22 }
  0xca   : > { %v650_v61 = vsel %vm370_vm1, %v639_v31, 0.0  ;;  %678 = vst.msk [vmem:[%s2184_s5 + $0x40] sm:$0xf] %vm673_vm8, %v669_v53  ;;  %v537_v57 = vadd.f32 %v524_v14, %v473_v56 }
  0xcb   : > { %v651_v63 = vadd.f32 %v650_v61, %v649_v42 }
  0xcc   : > { %v477_v5 = vpop.f32.mrf.mxu1 }
  0xcd   : > { %v597_v16 = vpop.f32.mrf.mxu3 }
  0xce   : > { %v610_v46 = vadd.f32 %v597_v16, %v537_v57 }
  0xcf   : > { %v411_v18 = vpop.f32.mrf.mxu0 }
  0xd0   : > { %v622_v23 = vsel %vm370_vm1, %v610_v46, 0.0  ;;  %v640_v37 = vmul.f32 %v610_v46, %v610_v46  ;;  %v670_v25 = vpack.c.bf16 %v610_v46, %v610_v46  ;;  %v476_v54 = vadd.f32 %v475_v45, %v411_v18 }
  0xd1   : > { %v529_v6 = vpop.f32.mrf.mxu2  ;;  %v623_v7 = vadd.f32 %v622_v23, %v621_v60 }
  0xd2   : > { %v652_v15 = vsel %vm370_vm1, %v640_v37, 0.0  ;;  %679 = vst.msk [vmem:[%s2184_s5 + $0x50] sm:$0xf] %vm673_vm8, %v670_v25  ;;  %1672 = vmatmul.msk.bf16.gmra.mxu0 %vm370_vm1, %v2084_v24  ;;  %1686 = vmatmul.msk.bf16.gmra.mxu3 %vm370_vm1, %v2236_v47  ;;  %v538_v11 = vadd.f32 %v527_v59, %v476_v54 }
  0xd3   : > { %v653_v28 = vadd.f32 %v652_v15, %v651_v63 }
  0xd4   : > { %v797_v10 = vpop.f32.mrf.mxu1 }
  0xd5   : > { %v600_v20 = vpop.f32.mrf.mxu3 }
  0xd6   : > { %1706 = vmatmul.msk.bf16.vlgmr.msrb.gmra.mxu2 %vm370_vm1, %v1965_v48  ;;  %v611_v35 = vadd.f32 %v600_v20, %v538_v11 }
  0xd7   : > { %1701 = vmatmul.msk.bf16.vlgmr.msrb.gmra.mxu1 %vm370_vm1, %v1925_v13  ;;  %v413_v1 = vpop.f32.mrf.mxu0 }
  0xd8   : > { %v624_v55 = vsel %vm370_vm1, %v611_v35, 0.0  ;;  %v641_v29 = vmul.f32 %v611_v35, %v611_v35  ;;  %v671_v39 = vpack.c.bf16 %v611_v35, %v611_v35  ;;  %v478_v2 = vadd.f32 %v477_v5, %v413_v1 }
  0xd9   : > { %v831_v14 = vpop.f32.mrf.mxu2  ;;  %v625_v22 = vadd.f32 %v624_v55, %v623_v7 }
  0xda   : > { %v654_v34 = vsel %vm370_vm1, %v641_v29, 0.0  ;;  %680 = vst.msk [vmem:[%s2184_s5 + $0x60] sm:$0xf] %vm673_vm8, %v671_v39  ;;  %v539_v48 = vadd.f32 %v529_v6, %v478_v2 }
  0xdb   : > { %v655_v38 = vadd.f32 %v654_v34, %v653_v28 }
  0xdc   : > { %v799_v41 = vpop.f32.mrf.mxu1 }
  0xdd   : > { %v602_v42 = vpop.f32.mrf.mxu3 }
  0xde   : > { %v612_v45 = vadd.f32 %v602_v42, %v539_v48 }
  0xdf   : > { %v765_v12 = vpop.f32.mrf.mxu0 }
  0xe0   : > { %v626_v13 = vsel %vm370_vm1, %v612_v45, 0.0  ;;  %v642_v26 = vmul.f32 %v612_v45, %v612_v45  ;;  %v672_v27 = vpack.c.bf16 %v612_v45, %v612_v45  ;;  %v798_v3 = vadd.f32 %v797_v10, %v765_v12 }
  0xe1   : > { %v833_v40 = vpop.f32.mrf.mxu2  ;;  %v2255_v43 = vadd.f32 %v626_v13, %v625_v22 }
  0xe2   : > { %v656_v58 = vsel %vm370_vm1, %v642_v26, 0.0  ;;  %681 = vst.msk [vmem:[%s2184_s5 + $0x70] sm:$0xf] %vm673_vm8, %v672_v27  ;;  %1697 = vmatmul.msk.bf16.vlgmr.msrb.gmra.mxu0 %vm370_vm1, %v2035_v30  ;;  %1712 = vmatmul.msk.bf16.vlgmr.msrb.gmra.mxu3 %vm370_vm1, %v2075_v19  ;;  %v851_v31 = vadd.f32 %v831_v14, %v798_v3  ;;  %v1710_v30 = vrot.slane %v2199_v17, 9  ;;  %v1351_v19 = vrot.slane %v2212_v9, 5 }
  0xe3   : > { %v2264_v53 = vadd.f32 %v656_v58, %v655_v38 }
  0xe4   : > { %v802_v56 = vpop.f32.mrf.mxu1 }
  0xe5   : > { %v895_v59 = vpop.f32.mrf.mxu3 }
  0xe6   : > { %1707 = vmatmul.msk.bf16.gmra.mxu2 %vm370_vm1, %v2031_v51  ;;  %v915_v60 = vadd.f32 %v895_v59, %v851_v31  ;;  %v2276_v51 = vsel %vm2008_vm7, %v1710_v30, %v1351_v19 }
  0xe7   : > { %1702 = vmatmul.msk.bf16.gmra.mxu1 %vm370_vm1, %v1968_v49  ;;  %v767_v61 = vpop.f32.mrf.mxu0  ;;  %v1355_v30 = vunpack.c.l.b16 %v2276_v51 }
  0xe8   : > { %v975_v62 = vpack.c.bf16 %v915_v60, %v915_v60  ;;  %v800_v63 = vadd.f32 %v799_v41, %v767_v61  ;;  %v945_v18 = vmul.f32 %v915_v60, %v915_v60  ;;  %v923_v23 = vsel %vm370_vm1, %v915_v60, 0.0 }
  0xe9   : > { %v836_v5 = vpop.f32.mrf.mxu2 }
  0xea   : > { %1659 = vst.msk [vmem:[%s2184_s5 + $0x4] sm:$0xf] %vm673_vm8, %v975_v62  ;;  %v852_v16 = vadd.f32 %v833_v40, %v800_v63  ;;  %v953_v15 = vsel %vm370_vm1, %v945_v18, 0.0 }
  0xec   : > { %v804_v57 = vpop.f32.mrf.mxu1 }
  0xed   : > { %v897_v46 = vpop.f32.mrf.mxu3 }
  0xee   : > { %v916_v49 = vadd.f32 %v897_v46, %v852_v16  ;;  %v1356_v46 = vpack.c.b16 %v1355_v30, %v866_v32 }
  0xef   : > { %v770_v37 = vpop.f32.mrf.mxu0 }
  0xf0   : > { %v924_v25 = vsel %vm370_vm1, %v916_v49, 0.0  ;;  %v946_v17 = vmul.f32 %v916_v49, %v916_v49  ;;  %v976_v54 = vpack.c.bf16 %v916_v49, %v916_v49  ;;  %v803_v9 = vadd.f32 %v802_v56, %v770_v37 }
  0xf1   : > { %v838_v6 = vpop.f32.mrf.mxu2  ;;  %v925_v7 = vadd.f32 %v924_v25, %v923_v23 }
  0xf2   : > { %v954_v11 = vsel %vm370_vm1, %v946_v17, 0.0  ;;  %1660 = vst.msk [vmem:[%s2184_s5 + $0x14] sm:$0xf] %vm673_vm8, %v976_v54  ;;  %1698 = vmatmul.msk.bf16.gmra.mxu0 %vm370_vm1, %v2086_v33  ;;  %1713 = vmatmul.msk.bf16.gmra.mxu3 %vm370_vm1, %v2100_v36  ;;  %v853_v8 = vadd.f32 %v836_v5, %v803_v9 }
  0xf3   : > { %v955_v28 = vadd.f32 %v954_v11, %v953_v15 }
  0xf4   : > { %v807_v10 = vpop.f32.mrf.mxu1 }
  0xf5   : > { %v900_v20 = vpop.f32.mrf.mxu3 }
  0xf6   : > { %1708 = vmatmul.msk.bf16.gmra.mxu2 %vm370_vm1, %v2081_v21  ;;  %v917_v35 = vadd.f32 %v900_v20, %v853_v8 }
  0xf7   : > { %1703 = vmatmul.msk.bf16.gmra.mxu1 %vm370_vm1, %v2033_v52  ;;  %v772_v1 = vpop.f32.mrf.mxu0 }
  0xf8   : > { %v926_v55 = vsel %vm370_vm1, %v917_v35, 0.0  ;;  %v947_v29 = vmul.f32 %v917_v35, %v917_v35  ;;  %v977_v33 = vpack.c.bf16 %v917_v35, %v917_v35  ;;  %v805_v39 = vadd.f32 %v804_v57, %v772_v1 }
  0xf9   : > { %v841_v2 = vpop.f32.mrf.mxu2  ;;  %v927_v36 = vadd.f32 %v926_v55, %v925_v7  ;;  %v628_v35 = vrot.slane %v2255_v43, 4  ;;  %v658_v55 = vrot.slane %v2264_v53, 4 }
  0xfa   : > { %v956_v14 = vsel %vm370_vm1, %v947_v29, 0.0  ;;  %1661 = vst.msk [vmem:[%s2184_s5 + $0x24] sm:$0xf] %vm673_vm8, %v977_v33  ;;  %v854_v21 = vadd.f32 %v838_v6, %v805_v39 }
  0xfb   : > { %v957_v22 = vadd.f32 %v956_v14, %v955_v28 }
  0xfc   : > { %v809_v34 = vpop.f32.mrf.mxu1 }
  0xfd   : > { %v902_v38 = vpop.f32.mrf.mxu3 }
  0xfe   : > { %v918_v41 = vadd.f32 %v902_v38, %v854_v21 }
  0xff   : > { %v775_v48 = vpop.f32.mrf.mxu0 }
 0x100   : > { %v928_v52 = vsel %vm370_vm1, %v918_v41, 0.0  ;;  %v948_v42 = vmul.f32 %v918_v41, %v918_v41  ;;  %v978_v45 = vpack.c.bf16 %v918_v41, %v918_v41  ;;  %v808_v12 = vadd.f32 %v807_v10, %v775_v48 }
 0x101   : > { %v843_v13 = vpop.f32.mrf.mxu2  ;;  %v929_v26 = vadd.f32 %v928_v52, %v927_v36 }
 0x102   : > { %v958_v27 = vsel %vm370_vm1, %v948_v42, 0.0  ;;  %1662 = vst.msk [vmem:[%s2184_s5 + $0x34] sm:$0xf] %vm673_vm8, %v978_v45  ;;  %1699 = vmatmul.msk.bf16.gmra.mxu0 %vm370_vm1, %v2106_v50  ;;  %1714 = vmatmul.msk.bf16.gmra.mxu3 %vm370_vm1, %v2119_v44  ;;  %v855_v3 = vadd.f32 %v841_v2, %v808_v12  ;;  %v629_v2 = vadd.f32 %v628_v35, %v2255_v43 }
 0x103   : > { %v959_v40 = vadd.f32 %v958_v27, %v957_v22  ;;  %v659_v22 = vadd.f32 %v658_v55, %v2264_v53 }
 0x104   : > { %v812_v58 = vpop.f32.mrf.mxu1  ;;  %v630_v42 = vrot.slane %v629_v2, 2 }
 0x105   : > { %v905_v31 = vpop.f32.mrf.mxu3 }
 0x106   : > { %1709 = vmatmul.msk.bf16.gmra.mxu2 %vm370_vm1, %v2236_v47  ;;  %v919_v56 = vadd.f32 %v905_v31, %v855_v3  ;;  %v631_v53 = vadd.f32 %v630_v42, %v629_v2 }
 0x107   : > { %1704 = vmatmul.msk.bf16.gmra.mxu1 %vm370_vm1, %v2084_v24  ;;  %v777_v59 = vpop.f32.mrf.mxu0 }
 0x108   : > { %v930_v60 = vsel %vm370_vm1, %v919_v56, 0.0  ;;  %v949_v61 = vmul.f32 %v919_v56, %v919_v56  ;;  %v979_v50 = vpack.c.bf16 %v919_v56, %v919_v56  ;;  %v810_v62 = vadd.f32 %v809_v34, %v777_v59 }
 0x109   : > { %v846_v63 = vpop.f32.mrf.mxu2  ;;  %v931_v44 = vadd.f32 %v930_v60, %v929_v26  ;;  %v660_v26 = vrot.slane %v659_v22, 2 }
 0x10a   : > { %v960_v5 = vsel %vm370_vm1, %v949_v61, 0.0  ;;  %1663 = vst.msk [vmem:[%s2184_s5 + $0x44] sm:$0xf] %vm673_vm8, %v979_v50  ;;  %v856_v57 = vadd.f32 %v843_v13, %v810_v62 }
 0x10b   : > { %v961_v47 = vadd.f32 %v960_v5, %v959_v40  ;;  %v661_v59 = vadd.f32 %v660_v26, %v659_v22  ;;  %v632_v5 = vrot.slane %v631_v53, 1 }
 0x10c   : > { %v814_v19 = vpop.f32.mrf.mxu1 }
 0x10d   : > { %v907_v16 = vpop.f32.mrf.mxu3 }
 0x10e   : > { %v920_v24 = vadd.f32 %v907_v16, %v856_v57 }
 0x10f   : > { %v780_v18 = vpop.f32.mrf.mxu0 }
 0x110   : > { %v932_v49 = vsel %vm370_vm1, %v920_v24, 0.0  ;;  %v950_v23 = vmul.f32 %v920_v24, %v920_v24  ;;  %v980_v37 = vpack.c.bf16 %v920_v24, %v920_v24  ;;  %v813_v25 = vadd.f32 %v812_v58, %v780_v18 }
 0x111   : > { %v848_v17 = vpop.f32.mrf.mxu2  ;;  %v933_v54 = vadd.f32 %v932_v49, %v931_v44  ;;  %v633_v18 = vadd.f32 %v632_v5, %v631_v53 }
 0x112   : > { %v962_v9 = vsel %vm370_vm1, %v950_v23, 0.0  ;;  %1664 = vst.msk [vmem:[%s2184_s5 + $0x54] sm:$0xf] %vm673_vm8, %v980_v37  ;;  %1700 = vmatmul.msk.bf16.gmra.mxu0 %vm370_vm1, %v2162_v4  ;;  %1715 = vmatmul.msk.bf16.gmra.mxu3 %vm370_vm1, %v1356_v46  ;;  %v857_v0 = vadd.f32 %v846_v63, %v813_v25 }
 0x113   : > { %v963_v32 = vadd.f32 %v962_v9, %v961_v47 }
 0x114   : > { %v1040_v51 = vpop.f32.mrf.mxu1 }
 0x115   : > { %v910_v6 = vpop.f32.mrf.mxu3 }
 0x116   : > { %v921_v7 = vadd.f32 %v910_v6, %v857_v0 }
 0x117   : > { %v782_v15 = vpop.f32.mrf.mxu0 }
 0x118   : > { %v934_v11 = vsel %vm370_vm1, %v921_v7, 0.0  ;;  %v951_v8 = vmul.f32 %v921_v7, %v921_v7  ;;  %v981_v28 = vpack.c.bf16 %v921_v7, %v921_v7  ;;  %v815_v10 = vadd.f32 %v814_v19, %v782_v15 }
 0x119   : > { %v1080_v20 = vpop.f32.mrf.mxu2  ;;  %v935_v1 = vadd.f32 %v934_v11, %v933_v54  ;;  %v662_v19 = vrot.slane %v661_v59, 1 }
 0x11a   : > { %v964_v4 = vsel %vm370_vm1, %v951_v8, 0.0  ;;  %1665 = vst.msk [vmem:[%s2184_s5 + $0x64] sm:$0xf] %vm673_vm8, %v981_v28  ;;  %v858_v39 = vadd.f32 %v848_v17, %v815_v10 }
 0x11b   : > { %v965_v29 = vadd.f32 %v964_v4, %v963_v32  ;;  %v663_v54 = vadd.f32 %v662_v19, %v661_v59 }
 0x11c   : > { %v1042_v33 = vpop.f32.mrf.mxu1 }
 0x11d   : > { %v912_v36 = vpop.f32.mrf.mxu3 }
 0x11e   : > { %v922_v14 = vadd.f32 %v912_v36, %v858_v39 }
 0x11f   : > { %v1008_v34 = vpop.f32.mrf.mxu0 }
 0x120   : > { %v936_v21 = vsel %vm370_vm1, %v922_v14, 0.0  ;;  %v952_v38 = vmul.f32 %v922_v14, %v922_v14  ;;  %v982_v41 = vpack.c.bf16 %v922_v14, %v922_v14  ;;  %v1041_v48 = vadd.f32 %v1040_v51, %v1008_v34 }
 0x121   : > { %v1082_v52 = vpop.f32.mrf.mxu2  ;;  %v937_v45 = vadd.f32 %v936_v21, %v935_v1 }
 0x122   : > { %v966_v12 = vsel %vm370_vm1, %v952_v38, 0.0  ;;  %1666 = vst.msk [vmem:[%s2184_s5 + $0x74] sm:$0xf] %vm673_vm8, %v982_v41  ;;  %v1100_v13 = vadd.f32 %v1080_v20, %v1041_v48 }
 0x123   : > { %v938_v43 = vrot.slane %v937_v45, 4  ;;  %v967_v27 = vadd.f32 %v966_v12, %v965_v29 }
 0x124   : > { %v1045_v3 = vpop.f32.mrf.mxu1 }
 0x125   : > { %v939_v40 = vadd.f32 %v938_v43, %v937_v45  ;;  %v968_v58 = vrot.slane %v967_v27, 4  ;;  %v1141_v31 = vpop.f32.mrf.mxu3 }
 0x126   : > { %v1161_v56 = vadd.f32 %v1141_v31, %v1100_v13 }
 0x127   : > { %v940_v60 = vrot.slane %v939_v40, 2  ;;  %v969_v61 = vadd.f32 %v968_v58, %v967_v27  ;;  %v1010_v50 = vpop.f32.mrf.mxu0 }
 0x128   : > { %v1221_v62 = vpack.c.bf16 %v1161_v56, %v1161_v56  ;;  %v1043_v63 = vadd.f32 %v1042_v33, %v1010_v50  ;;  %v1191_v25 = vmul.f32 %v1161_v56, %v1161_v56  ;;  %v1169_v32 = vsel %vm370_vm1, %v1161_v56, 0.0 }
 0x129   : > { %v1085_v44 = vpop.f32.mrf.mxu2  ;;  %v941_v30 = vadd.f32 %v940_v60, %v939_v40  ;;  %v970_v47 = vrot.slane %v969_v61, 2 }
 0x12a   : > { %1687 = vst.msk [vmem:[%s2184_s5 + $0x8] sm:$0xf] %vm673_vm8, %v1221_v62  ;;  %v1101_v46 = vadd.f32 %v1082_v52, %v1043_v63  ;;  %v1199_v20 = vsel %vm370_vm1, %v1191_v25, 0.0 }
 0x12b   : > { %v942_v57 = vrot.slane %v941_v30, 1  ;;  %v971_v16 = vadd.f32 %v970_v47, %v969_v61 }
 0x12c   : > { %v1047_v24 = vpop.f32.mrf.mxu1 }
 0x12d   : > { %v943_v49 = vadd.f32 %v942_v57, %v941_v30  ;;  %v972_v23 = vrot.slane %v971_v16, 1  ;;  %v1143_v37 = vpop.f32.mrf.mxu3 }
 0x12e   : > { %v1162_v17 = vadd.f32 %v1143_v37, %v1101_v46 }
 0x12f   : > { %v2336_v9 = vadd.f32 %v943_v49, %v633_v18  ;;  %v973_v0 = vadd.f32 %v972_v23, %v971_v16  ;;  %v1013_v51 = vpop.f32.mrf.mxu0 }
 0x130   : > { %v1170_v6 = vsel %vm370_vm1, %v1162_v17, 0.0  ;;  %v1192_v7 = vmul.f32 %v1162_v17, %v1162_v17  ;;  %v1222_v15 = vpack.c.bf16 %v1162_v17, %v1162_v17  ;;  %v1046_v11 = vadd.f32 %v1045_v3, %v1013_v51 }
 0x131   : > { %v1087_v8 = vpop.f32.mrf.mxu2  ;;  %v2340_v28 = vadd.f32 %v973_v0, %v663_v54  ;;  %v1171_v10 = vadd.f32 %v1170_v6, %v1169_v32 }
 0x132   : > { %v1200_v35 = vsel %vm370_vm1, %v1192_v7, 0.0  ;;  %1688 = vst.msk [vmem:[%s2184_s5 + $0x18] sm:$0xf] %vm673_vm8, %v1222_v15  ;;  %v1102_v1 = vadd.f32 %v1085_v44, %v1046_v11 }
 0x133   : > { %v1201_v4 = vadd.f32 %v1200_v35, %v1199_v20 }
 0x134   : > { %v1050_v55 = vpop.f32.mrf.mxu1 }
 0x135   : > { %v1146_v29 = vpop.f32.mrf.mxu3 }
 0x136   : > { %v1163_v33 = vadd.f32 %v1146_v29, %v1102_v1 }
 0x137   : > { %v1015_v39 = vpop.f32.mrf.mxu0 }
 0x138   : > { %v1172_v2 = vsel %vm370_vm1, %v1163_v33, 0.0  ;;  %v1193_v36 = vmul.f32 %v1163_v33, %v1163_v33  ;;  %v1223_v14 = vpack.c.bf16 %v1163_v33, %v1163_v33  ;;  %v1048_v22 = vadd.f32 %v1047_v24, %v1015_v39 }
 0x139   : > { %v1090_v34 = vpop.f32.mrf.mxu2  ;;  %v1173_v21 = vadd.f32 %v1172_v2, %v1171_v10 }
 0x13a   : > { %v1202_v38 = vsel %vm370_vm1, %v1193_v36, 0.0  ;;  %1689 = vst.msk [vmem:[%s2184_s5 + $0x28] sm:$0xf] %vm673_vm8, %v1223_v14  ;;  %v1103_v52 = vadd.f32 %v1087_v8, %v1048_v22 }
 0x13b   : > { %v1203_v41 = vadd.f32 %v1202_v38, %v1201_v4 }
 0x13c   : > { %v1052_v48 = vpop.f32.mrf.mxu1 }
 0x13d   : > { %v1148_v42 = vpop.f32.mrf.mxu3 }
 0x13e   : > { %v1164_v45 = vadd.f32 %v1148_v42, %v1103_v52 }
 0x13f   : > { %v1018_v12 = vpop.f32.mrf.mxu0 }
 0x140   : > { %v1174_v13 = vsel %vm370_vm1, %v1164_v45, 0.0  ;;  %v1194_v26 = vmul.f32 %v1164_v45, %v1164_v45  ;;  %v1224_v43 = vpack.c.bf16 %v1164_v45, %v1164_v45  ;;  %v1051_v27 = vadd.f32 %v1050_v55, %v1018_v12 }
 0x141   : > { %v1092_v3 = vpop.f32.mrf.mxu2  ;;  %v1175_v53 = vadd.f32 %v1174_v13, %v1173_v21 }
 0x142   : > { %v1204_v40 = vsel %vm370_vm1, %v1194_v26, 0.0  ;;  %1690 = vst.msk [vmem:[%s2184_s5 + $0x38] sm:$0xf] %vm673_vm8, %v1224_v43  ;;  %v1104_v58 = vadd.f32 %v1090_v34, %v1051_v27 }
 0x143   : > { %v1205_v31 = vadd.f32 %v1204_v40, %v1203_v41 }
 0x144   : > { %v1055_v56 = vpop.f32.mrf.mxu1 }
 0x145   : > { %v1151_v59 = vpop.f32.mrf.mxu3 }
 0x146   : > { %v1165_v60 = vadd.f32 %v1151_v59, %v1104_v58 }
 0x147   : > { %v1020_v61 = vpop.f32.mrf.mxu0 }
 0x148   : > { %v1176_v50 = vsel %vm370_vm1, %v1165_v60, 0.0  ;;  %v1195_v62 = vmul.f32 %v1165_v60, %v1165_v60  ;;  %v1225_v63 = vpack.c.bf16 %v1165_v60, %v1165_v60  ;;  %v1053_v44 = vadd.f32 %v1052_v48, %v1020_v61 }
 0x149   : > { %v1095_v5 = vpop.f32.mrf.mxu2  ;;  %v1177_v30 = vadd.f32 %v1176_v50, %v1175_v53 }
 0x14a   : > { %v1206_v47 = vsel %vm370_vm1, %v1195_v62, 0.0  ;;  %1691 = vst.msk [vmem:[%s2184_s5 + $0x48] sm:$0xf] %vm673_vm8, %v1225_v63  ;;  %v1105_v16 = vadd.f32 %v1092_v3, %v1053_v44 }
 0x14b   : > { %v1207_v19 = vadd.f32 %v1206_v47, %v1205_v31 }
 0x14c   : > { %v1057_v57 = vpop.f32.mrf.mxu1 }
 0x14d   : > { %v1153_v24 = vpop.f32.mrf.mxu3 }
 0x14e   : > { %v1166_v46 = vadd.f32 %v1153_v24, %v1105_v16 }
 0x14f   : > { %v1023_v18 = vpop.f32.mrf.mxu0 }
 0x150   : > { %v1178_v49 = vsel %vm370_vm1, %v1166_v46, 0.0  ;;  %v1196_v23 = vmul.f32 %v1166_v46, %v1166_v46  ;;  %v1226_v37 = vpack.c.bf16 %v1166_v46, %v1166_v46  ;;  %v1056_v25 = vadd.f32 %v1055_v56, %v1023_v18 }
 0x151   : > { %v1097_v17 = vpop.f32.mrf.mxu2  ;;  %v1179_v54 = vadd.f32 %v1178_v49, %v1177_v30 }
 0x152   : > { %v1208_v0 = vsel %vm370_vm1, %v1196_v23, 0.0  ;;  %1692 = vst.msk [vmem:[%s2184_s5 + $0x58] sm:$0xf] %vm673_vm8, %v1226_v37  ;;  %v1106_v32 = vadd.f32 %v1095_v5, %v1056_v25 }
 0x153   : > { %v1209_v51 = vadd.f32 %v1208_v0, %v1207_v19 }
 0x154   : > { %v1286_v6 = vpop.f32.mrf.mxu1 }
 0x155   : > { %v1156_v7 = vpop.f32.mrf.mxu3 }
 0x156   : > { %v1167_v15 = vadd.f32 %v1156_v7, %v1106_v32 }
 0x157   : > { %v1025_v11 = vpop.f32.mrf.mxu0 }
 0x158   : > { %v1180_v8 = vsel %vm370_vm1, %v1167_v15, 0.0  ;;  %v1197_v10 = vmul.f32 %v1167_v15, %v1167_v15  ;;  %v1227_v20 = vpack.c.bf16 %v1167_v15, %v1167_v15  ;;  %v1058_v35 = vadd.f32 %v1057_v57, %v1025_v11 }
 0x159   : > { %v1320_v1 = vpop.f32.mrf.mxu2  ;;  %v1181_v4 = vadd.f32 %v1180_v8, %v1179_v54 }
 0x15a   : > { %v1210_v55 = vsel %vm370_vm1, %v1197_v10, 0.0  ;;  %1693 = vst.msk [vmem:[%s2184_s5 + $0x68] sm:$0xf] %vm673_vm8, %v1227_v20  ;;  %v1107_v39 = vadd.f32 %v1097_v17, %v1058_v35 }
 0x15b   : > { %v1211_v29 = vadd.f32 %v1210_v55, %v1209_v51 }
 0x15c   : > { %v1288_v33 = vpop.f32.mrf.mxu1 }
 0x15d   : > { %v1158_v2 = vpop.f32.mrf.mxu3 }
 0x15e   : > { %v1168_v36 = vadd.f32 %v1158_v2, %v1107_v39 }
 0x15f   : > { %v1254_v14 = vpop.f32.mrf.mxu0 }
 0x160   : > { %v1182_v22 = vsel %vm370_vm1, %v1168_v36, 0.0  ;;  %v1198_v34 = vmul.f32 %v1168_v36, %v1168_v36  ;;  %v1228_v21 = vpack.c.bf16 %v1168_v36, %v1168_v36  ;;  %v1287_v38 = vadd.f32 %v1286_v6, %v1254_v14 }
 0x161   : > { %v1322_v41 = vpop.f32.mrf.mxu2  ;;  %v1183_v48 = vadd.f32 %v1182_v22, %v1181_v4 }
 0x162   : > { %v1212_v52 = vsel %vm370_vm1, %v1198_v34, 0.0  ;;  %1694 = vst.msk [vmem:[%s2184_s5 + $0x78] sm:$0xf] %vm673_vm8, %v1228_v21  ;;  %v1340_v42 = vadd.f32 %v1320_v1, %v1287_v38 }
 0x163   : > { %v1184_v45 = vrot.slane %v1183_v48, 4  ;;  %v1213_v12 = vadd.f32 %v1212_v52, %v1211_v29 }
 0x164   : > { %v1291_v27 = vpop.f32.mrf.mxu1 }
 0x165   : > { %v1185_v13 = vadd.f32 %v1184_v45, %v1183_v48  ;;  %v1214_v26 = vrot.slane %v1213_v12, 4  ;;  %v1372_v43 = vpop.f32.mrf.mxu3 }
 0x166   : > { %v2370_v3 = vadd.f32 %v1372_v43, %v1340_v42 }
 0x167   : > { %v1186_v53 = vrot.slane %v1185_v13, 2  ;;  %v1215_v40 = vadd.f32 %v1214_v26, %v1213_v12  ;;  %v1256_v58 = vpop.f32.mrf.mxu0 }
 0x168   : > { %v1452_v31 = vpack.c.bf16 %v2370_v3, %v2370_v3  ;;  %v1289_v56 = vadd.f32 %v1288_v33, %v1256_v58 }
 0x169   : > { %v1187_v59 = vadd.f32 %v1186_v53, %v1185_v13  ;;  %v1216_v60 = vrot.slane %v1215_v40, 2  ;;  %v1325_v61 = vpop.f32.mrf.mxu2  ;;  %v1400_v13 = vsel %vm370_vm1, %v2370_v3, 0.0 }
 0x16a   : > { %1716 = vst.msk [vmem:[%s2184_s5 + $0xc] sm:$0xf] %vm673_vm8, %v1452_v31  ;;  %v1341_v63 = vadd.f32 %v1322_v41, %v1289_v56  ;;  %v1422_v41 = vmul.f32 %v2370_v3, %v2370_v3 }
 0x16b   : > { %v1188_v50 = vrot.slane %v1187_v59, 1  ;;  %v1217_v62 = vadd.f32 %v1216_v60, %v1215_v40 }
 0x16c   : > { %v1293_v24 = vpop.f32.mrf.mxu1 }
 0x16d   : > { %v1189_v44 = vadd.f32 %v1188_v50, %v1187_v59  ;;  %v1218_v5 = vrot.slane %v1217_v62, 1  ;;  %v1374_v30 = vpop.f32.mrf.mxu3 }
 0x16e   : > { %v1393_v47 = vadd.f32 %v1374_v30, %v1341_v63 }
 0x16f   : > { %v2377_v19 = vadd.f32 %v1189_v44, %v2336_v9  ;;  %v1219_v57 = vadd.f32 %v1218_v5, %v1217_v62  ;;  %v1259_v16 = vpop.f32.mrf.mxu0 }
 0x170   : > { %v1453_v46 = vpack.c.bf16 %v1393_v47, %v1393_v47  ;;  %v1292_v18 = vadd.f32 %v1291_v27, %v1259_v16  ;;  %v1423_v34 = vmul.f32 %v1393_v47, %v1393_v47  ;;  %v1401_v52 = vsel %vm370_vm1, %v1393_v47, 0.0 }
 0x171   : > { %v2380_v49 = vadd.f32 %v1219_v57, %v2340_v28  ;;  %v1327_v37 = vpop.f32.mrf.mxu2  ;;  %v1430_v27 = vsel %vm370_vm1, %v1422_v41, 0.0  ;;  %v1402_v53 = vadd.f32 %v1401_v52, %v1400_v13 }
 0x172   : > { %1717 = vst.msk [vmem:[%s2184_s5 + $0x1c] sm:$0xf] %vm673_vm8, %v1453_v46  ;;  %v1342_v23 = vadd.f32 %v1325_v61, %v1292_v18  ;;  %v1431_v26 = vsel %vm370_vm1, %v1423_v34, 0.0 }
 0x173   : > { %v1432_v60 = vadd.f32 %v1431_v26, %v1430_v27 }
 0x174   : > { %v1296_v32 = vpop.f32.mrf.mxu1 }
 0x175   : > { %v1377_v25 = vpop.f32.mrf.mxu3 }
 0x176   : > { %v1394_v17 = vadd.f32 %v1377_v25, %v1342_v23 }
 0x177   : > { %v1261_v54 = vpop.f32.mrf.mxu0 }
 0x178   : > { %v1454_v0 = vpack.c.bf16 %v1394_v17, %v1394_v17  ;;  %v1294_v9 = vadd.f32 %v1293_v24, %v1261_v54  ;;  %v1424_v42 = vmul.f32 %v1394_v17, %v1394_v17  ;;  %v1403_v43 = vsel %vm370_vm1, %v1394_v17, 0.0 }
 0x179   : > { %v1330_v6 = vpop.f32.mrf.mxu2  ;;  %v1404_v61 = vadd.f32 %v1403_v43, %v1402_v53 }
 0x17a   : > { %1718 = vst.msk [vmem:[%s2184_s5 + $0x2c] sm:$0xf] %vm673_vm8, %v1454_v0  ;;  %v1343_v51 = vadd.f32 %v1327_v37, %v1294_v9  ;;  %v1433_v58 = vsel %vm370_vm1, %v1424_v42, 0.0 }
 0x17b   : > { %v1434_v47 = vadd.f32 %v1433_v58, %v1432_v60 }
 0x17c   : > { %v1298_v20 = vpop.f32.mrf.mxu1 }
 0x17d   : > { %v1379_v7 = vpop.f32.mrf.mxu3 }
 0x17e   : > { %v1395_v15 = vadd.f32 %v1379_v7, %v1343_v51 }
 0x17f   : > { %v1264_v28 = vpop.f32.mrf.mxu0 }
 0x180   : > { %v1455_v11 = vpack.c.bf16 %v1395_v15, %v1395_v15  ;;  %v1297_v8 = vadd.f32 %v1296_v32, %v1264_v28  ;;  %v1425_v12 = vmul.f32 %v1395_v15, %v1395_v15  ;;  %v1405_v31 = vsel %vm370_vm1, %v1395_v15, 0.0 }
 0x181   : > { %v1332_v4 = vpop.f32.mrf.mxu2  ;;  %v1406_v57 = vadd.f32 %v1405_v31, %v1404_v61 }
 0x182   : > { %1719 = vst.msk [vmem:[%s2184_s5 + $0x3c] sm:$0xf] %vm673_vm8, %v1455_v11  ;;  %v1344_v10 = vadd.f32 %v1330_v6, %v1297_v8  ;;  %v1435_v50 = vsel %vm370_vm1, %v1425_v12, 0.0 }
 0x183   : > { %v1436_v18 = vadd.f32 %v1435_v50, %v1434_v47 }
 0x184   : > { %v1301_v2 = vpop.f32.mrf.mxu1 }
 0x185   : > { %v1382_v35 = vpop.f32.mrf.mxu3 }
 0x186   : > { %v1396_v1 = vadd.f32 %v1382_v35, %v1344_v10 }
 0x187   : > { %v1266_v55 = vpop.f32.mrf.mxu0 }
 0x188   : > { %v1456_v29 = vpack.c.bf16 %v1396_v1, %v1396_v1  ;;  %v1299_v33 = vadd.f32 %v1298_v20, %v1266_v55  ;;  %v1426_v56 = vmul.f32 %v1396_v1, %v1396_v1  ;;  %v1407_v63 = vsel %vm370_vm1, %v1396_v1, 0.0 }
 0x189   : > { %v1335_v48 = vpop.f32.mrf.mxu2  ;;  %v1408_v23 = vadd.f32 %v1407_v63, %v1406_v57 }
 0x18a   : > { %1720 = vst.msk [vmem:[%s2184_s5 + $0x4c] sm:$0xf] %vm673_vm8, %v1456_v29  ;;  %v1345_v39 = vadd.f32 %v1332_v4, %v1299_v33  ;;  %v1437_v16 = vsel %vm370_vm1, %v1426_v56, 0.0 }
 0x18b   : > { %v1438_v0 = vadd.f32 %v1437_v16, %v1436_v18 }
 0x18c   : > { %v1303_v3 = vpop.f32.mrf.mxu1 }
 0x18d   : > { %v1384_v36 = vpop.f32.mrf.mxu3 }
 0x18e   : > { %v1397_v14 = vadd.f32 %v1384_v36, %v1345_v39 }
 0x18f   : > { %v1269_v22 = vpop.f32.mrf.mxu0 }
 0x190   : > { %v1457_v21 = vpack.c.bf16 %v1397_v14, %v1397_v14  ;;  %v1302_v38 = vadd.f32 %v1301_v2, %v1269_v22  ;;  %v1427_v44 = vmul.f32 %v1397_v14, %v1397_v14  ;;  %v1409_v24 = vsel %vm370_vm1, %v1397_v14, 0.0 }
 0x191   : > { %v1337_v37 = vpop.f32.mrf.mxu2  ;;  %v1410_v9 = vadd.f32 %v1409_v24, %v1408_v23 }
 0x192   : > { %1721 = vst.msk [vmem:[%s2184_s5 + $0x5c] sm:$0xf] %vm673_vm8, %v1457_v21  ;;  %v1346_v45 = vadd.f32 %v1335_v48, %v1302_v38  ;;  %v1439_v25 = vsel %vm370_vm1, %v1427_v44, 0.0 }
 0x193   : > { %v1440_v7 = vadd.f32 %v1439_v25, %v1438_v0 }
 0x195   : > { %v1387_v40 = vpop.f32.mrf.mxu3 }
 0x196   : > { %v1398_v59 = vadd.f32 %v1387_v40, %v1346_v45 }
 0x197   : > { %v1271_v62 = vpop.f32.mrf.mxu0 }
 0x198   : > { %v1458_v5 = vpack.c.bf16 %v1398_v59, %v1398_v59  ;;  %v1304_v30 = vadd.f32 %v1303_v3, %v1271_v62  ;;  %v1428_v46 = vmul.f32 %v1398_v59, %v1398_v59  ;;  %v1411_v17 = vsel %vm370_vm1, %v1398_v59, 0.0 }
 0x199   : > { %v1412_v15 = vadd.f32 %v1411_v17, %v1410_v9 }
 0x19a   : > { %1722 = vst.msk [vmem:[%s2184_s5 + $0x6c] sm:$0xf] %vm673_vm8, %v1458_v5  ;;  %v1347_v54 = vadd.f32 %v1337_v37, %v1304_v30  ;;  %v1441_v51 = vsel %vm370_vm1, %v1428_v46, 0.0 }
 0x19b   : > { %v1442_v10 = vadd.f32 %v1441_v51, %v1440_v7 }
 0x19d   : > { %v1389_v32 = vpop.f32.mrf.mxu3 }
 0x19e   : > { %v1399_v6 = vadd.f32 %v1389_v32, %v1347_v54 }
 0x1a0   : > { %v1413_v28 = vsel %vm370_vm1, %v1399_v6, 0.0  ;;  %v1429_v11 = vmul.f32 %v1399_v6, %v1399_v6  ;;  %v1459_v8 = vpack.c.bf16 %v1399_v6, %v1399_v6 }
 0x1a1   : > { %v1414_v20 = vadd.f32 %v1413_v28, %v1412_v15 }
 0x1a2   : > { %v1443_v35 = vsel %vm370_vm1, %v1429_v11, 0.0  ;;  %1723 = vst.msk [vmem:[%s2184_s5 + $0x7c] sm:$0xf] %vm673_vm8, %v1459_v8 }
 0x1a3   : > { %v1415_v1 = vrot.slane %v1414_v20, 4  ;;  %v1444_v4 = vadd.f32 %v1443_v35, %v1442_v10 }
 0x1a5   : > { %v1416_v55 = vadd.f32 %v1415_v1, %v1414_v20  ;;  %v1445_v29 = vrot.slane %v1444_v4, 4 }
 0x1a7   : > { %v1417_v33 = vrot.slane %v1416_v55, 2  ;;  %v1446_v39 = vadd.f32 %v1445_v29, %v1444_v4 }
 0x1a9   : > { %v1418_v2 = vadd.f32 %v1417_v33, %v1416_v55  ;;  %v1447_v36 = vrot.slane %v1446_v39, 2 }
 0x1ab   : > { %v1419_v14 = vrot.slane %v1418_v2, 1  ;;  %v1448_v22 = vadd.f32 %v1447_v36, %v1446_v39 }
 0x1ad   : > { %v1420_v34 = vadd.f32 %v1419_v14, %v1418_v2  ;;  %v1449_v21 = vrot.slane %v1448_v22, 1 }
 0x1af   : > { %v1421_v38 = vadd.f32 %v1420_v34, %v2377_v19  ;;  %v1450_v41 = vadd.f32 %v1449_v21, %v1448_v22 }
 0x1b1   : > { %v1451_v48 = vadd.f32 %v1450_v41, %v2380_v49  ;;  %1470 = vst.msk [vmem:[%s214_s9] sm:$0x1] %vm1469_vm9, %v1421_v38 }
 0x1b3   : > { %1471 = vst.msk [vmem:[%s214_s9 + $0x1] sm:$0x1] %vm1469_vm9, %v1451_v48 }
 0x1b4 PF: > { %s14_s14 = sadd.s32 1, %s1774_s14   ;;  %s2438_s12 = smov %s1770_s13 }
 0x1b5   : > { %p11_p5 = scmp.ge.s32.totalorder %s14_s14, 4   ;;  %s2439_s13 = smov %s2441_s15 }
 0x1b7   :  { %13 = sbr.rel (!%p11_p5) target bundleno = 2 (0x2), region = 89 }

// kernel: up_adaptive_conv.3
= control target key start
LH: loop header
LB: loop body
LE: loop exit
PB: predicated region body
PF: predicated region fallthrough
CT: control target
= control target key end

     0   :  { %s696_s24 = smov 0   ;;  %s698_s25 = smov 0   ;;  %s747_s0 = inlined_call_operand.vmem [shape: f32[2,8,128], index: 0, kind: input, shape index: {}]   ;;  %s748_s1 = inlined_call_operand.vmem [shape: bf16[2,8,128], index: 1, kind: input, shape index: {}]   ;;  %s749_s2 = inlined_call_operand.vmem [shape: f32[2,8,128], index: 2, kind: input, shape index: {}]   ;;  %s750_s3 = inlined_call_operand.vmem [shape: f32[2,8,128], index: 3, kind: input, shape index: {}]   ;;  %s751_s4 = inlined_call_operand.vmem [shape: f32[1,128], index: 4, kind: input, shape index: {}]   ;;  %s752_s5 = inlined_call_operand.vmem [shape: f32[1,128], index: 5, kind: input, shape index: {}]   ;;  %s753_s6 = inlined_call_operand.vmem [shape: f32[2,8,128], index: 6, kind: output, shape index: {0}]   ;;  %s754_s7 = inlined_call_operand.vmem [shape: f32[2,8,128], index: 7, kind: output, shape index: {1}]  }
   0x1   :  { %s700_s26 = smov 0  }
   0x2 LB: > { %s30_s27 = sadd.s32 1, %s650_s25  ;;  %p597_p0 = scmp.ge.s32.totalorder %s654_s26, 1  ;;  %s654_s26 = sphi %s700_s26, %s18_s26   ;;  %s650_s25 = sphi %s698_s25, %s756_s25   ;;  %s646_s24 = sphi %s696_s24, %s755_s24  }
   0x3   : > { %p32_p1 = scmp.ge.s32.totalorder %s30_s27, 2  ;;  %p302_p2 = scmp.lt.s32.totalorder %s654_s26, 3 }
   0x5   : > { %s758_s27 = smov (%p32_p1, %s30_s27), 0  ;;  %p303_p3 = pnand %p597_p0, %p302_p2 }
   0x6   : > { %p366_p4 = scmp.lt.s32.totalorder (!%p303_p3), %s646_s24, 1 }
   0x7   : > { %306 = sbr.rel (%p303_p3) target bundleno = 29 (0x1d), region = 44 }
   0xc   : > { %s760_s24 = smov (!%p366_p4, %s646_s24), 1  ;;  %v630_v0 = vld [vmem:[%s751_s4] ss:$0 sm:$0xff] }
   0xd   : > { %s598_s28 = sshll.u32 %s760_s24, 3  ;;  %s599_s29 = sshll.u32 %s760_s24, 2  ;;  %v631_v5 = vld [vmem:[%s752_s5] ss:$0 sm:$0xff] }
   0xe   : > { %s372_s9 = scalar_lea.vmem %s747_s0, %s598_s28  ;;  %s379_s12 = scalar_lea.vmem %s748_s1, %s599_s29 }
   0xf   : > { %s386_s17 = scalar_lea.vmem %s749_s2, %s598_s28  ;;  %v408_v1 = vld [vmem:[%s372_s9] sm:$0xff]  ;;  %s393_s20 = scalar_lea.vmem %s750_s3, %s598_s28 }
  0x10   : > { %v415_v2 = vld [vmem:[%s379_s12] sm:$0xf]  ;;  %s400_s29 = scalar_lea.vmem %s753_s6, %s598_s28  ;;  %s407_s9 = scalar_lea.vmem %s754_s7, %s598_s28 }
  0x11   : > { %v409_v3 = vld [vmem:[%s386_s17] sm:$0xff]  ;;  %v416_v4 = vunpack.c.l.bf16 %v415_v2 }
  0x12   : > { %v410_v6 = vmul.f32 %v409_v3, %v408_v1  ;;  %v427_v9 = vld [vmem:[%s393_s20] sm:$0xff] }
  0x13   : > { %v421_v7 = vmul.f32 %v630_v0, %v416_v4 }
  0x14   : > { %vm411_vm0 = vcmp.ge.f32.partialorder %v410_v6, 0.0  ;;  %v412_v8 = vmul.f32 0.2, %v410_v6 }
  0x15   : > { %v426_v10 = vadd.f32 %v631_v5, %v421_v7 }
  0x16   : > { %v413_v11 = vsel %vm411_vm0, %v410_v6, %v412_v8 }
  0x17   : > { %414 = vst [vmem:[%s400_s29] sm:$0xff] %v413_v11  ;;  %v428_v12 = vmul.f32 %v427_v9, %v426_v10 }
  0x19   : > { %vm429_vm1 = vcmp.ge.f32.partialorder %v428_v12, 0.0  ;;  %v430_v13 = vmul.f32 0.2, %v428_v12 }
  0x1b   : > { %v431_v14 = vsel %vm429_vm1, %v428_v12, %v430_v13 }
  0x1c   : > { %432 = vst [vmem:[%s407_s9] sm:$0xff] %v431_v14 }
  0x1d PF: > { %s18_s26 = sadd.s32 1, %s654_s26   ;;  %s755_s24 = smov %s650_s25 }
  0x1e   : > { %p15_p5 = scmp.ge.s32.totalorder %s18_s26, 4   ;;  %s756_s25 = smov %s758_s27 }
  0x20   :  { %17 = sbr.rel (!%p15_p5) target bundleno = 2 (0x2), region = 95 }

</bundles_post_ra>
